<compile_context>
chip_gen: v5e
topology: v5e:2x2
jax: 0.10.0
libtpu: 0.0.40
codegen_flags: <defaults>
</compile_context>

<pallas_src>
import functools

import jax
import jax.numpy as jnp
from jax.experimental import pallas as pl
from jax.experimental.pallas import tpu as pltpu

# ----------------------------- small synthetic BERT config -----------------------------
VOCAB_SIZE = 100
TYPE_VOCAB_SIZE = 2
MAX_POS = 32
HIDDEN = 32
NUM_LAYERS = 2
NUM_HEADS = 4
HEAD_DIM = HIDDEN // NUM_HEADS
INTERMEDIATE = 64
N_CLASSES = 3
CPAD = 128                      # lane-dense padded class dimension for the classifier head
LN_EPS = 1e-12
SLAB_W = 128                    # lane width of the packed constant/bias slab

_VMEM = pl.BlockSpec(memory_space=pltpu.MemorySpace.VMEM)


def _rup8(x):
    return (x + 7) // 8 * 8


def _slab_layout(batch, seq):
    """Static row offsets of everything packed into the single [rows, 128] slab."""
    T = batch * seq
    C = NUM_HEADS * T
    off, r = {}, 0
    off["emb_ln_g"], r = r, r + 1
    off["emb_ln_b"], r = r, r + 1
    off["layers"], r = r, r + 10 * NUM_LAYERS      # bq,bk,bv,bo,ln1_g,ln1_b,bi,bf,ln2_g,ln2_b
    off["pool_b"], r = r, r + 1
    off["cls_b"], r = r, r + 1
    off["onehot"], r = r, r + batch
    r = _rup8(r); off["sel"], r = r, r + batch     # CLS selection matrix [B, T]
    r = _rup8(r); off["addmask"], r = r, r + T     # additive attention mask [T, nh*T]
    r = _rup8(r); off["rrep"], r = r, r + C        # key/value replication matrix [nh*T, T]
    r = _rup8(r); off["headmask"], r = r, r + C    # per-head lane mask [nh*T, H]
    r = _rup8(r); off["blockones"], r = r, r + C   # per-head-block summation matrix [nh*T, nh*T]
    off["rows"] = _rup8(r)
    return off


# --------------------------------- in-kernel helpers ------------------------------------
def _layer_norm(x, g, b, eps=LN_EPS):
    mu = jnp.mean(x, axis=-1, keepdims=True)
    d = x - mu
    var = jnp.mean(d * d, axis=-1, keepdims=True)
    return d * jax.lax.rsqrt(var + eps) * g + b


def _gelu(x):
    # TODO(synk): tanh-approximate GELU (HF BertIntermediate uses exact erf GELU).
    return 0.5 * x * (1.0 + jnp.tanh(0.7978845608028654 * (x + 0.044715 * x * x * x)))


# ------------------------------- fused whole-model kernel -------------------------------
def _bert_fused_kernel(
    emb_ref, whh_ref, whi_ref, wih_ref, wcls_ref, slab_ref,     # inputs (6)
    out_ref,                                                     # output: [out_rows, 128]
    *, batch, seq, n_heads, head_dim, n_layers, inter, scale, off, out_rows):
    H = n_heads * head_dim
    T = batch * seq
    C = n_heads * T
    bf16 = jnp.bfloat16

    def vec(row, width=H):
        # one packed bias / LN-param row -> [1, width] (broadcasts over token rows)
        return slab_ref[row:row + 1, 0:width]

    # constant matrices, read once from the packed slab (single DMA'd input)
    addmask = slab_ref[off["addmask"]:off["addmask"] + T, 0:C]          # [T, C]
    rrep = slab_ref[off["rrep"]:off["rrep"] + C, 0:T]                   # [C, T]
    headmask = slab_ref[off["headmask"]:off["headmask"] + C, 0:H]       # [C, H]
    blockones = slab_ref[off["blockones"]:off["blockones"] + C, 0:C]    # [C, C]
    sel = slab_ref[off["sel"]:off["sel"] + batch, 0:T]                  # [B, T]
    onehot = slab_ref[off["onehot"]:off["onehot"] + batch, 0:CPAD]      # [B, 128]

    # ---- embedding LayerNorm (f32) ----
    h = _layer_norm(emb_ref[...], vec(off["emb_ln_g"]), vec(off["emb_ln_b"]))   # [T, H]

    # ---- encoder layers (fully unrolled) ----
    for l in range(n_layers):
        b0 = off["layers"] + 10 * l
        h16 = h.astype(bf16)

        # Q/K/V projections: 3 separate lane-dense bf16 MXU passes (no sub-128 slicing)
        q = jnp.dot(h16, whh_ref[0 * n_layers + l], preferred_element_type=jnp.float32) + vec(b0 + 0)
        k = jnp.dot(h16, whh_ref[1 * n_layers + l], preferred_element_type=jnp.float32) + vec(b0 + 1)
        v = jnp.dot(h16, whh_ref[2 * n_layers + l], preferred_element_type=jnp.float32) + vec(b0 + 2)

        # Replicate K/V once per head block and mask to that head's lanes:
        #   kexp[hd*T + t', d] = k[t', d] if d belongs to head hd else 0  (same for v)
        kexp = jnp.dot(rrep, k, preferred_element_type=jnp.float32) * headmask   # [C, H]
        vexp = jnp.dot(rrep, v, preferred_element_type=jnp.float32) * headmask   # [C, H]

        # All heads' scores in one matmul: s[t, hd*T + t'] = <q_hd[t], k_hd[t']>
        s = jnp.einsum("td,cd->tc", q, kexp,
                       preferred_element_type=jnp.float32) * scale + addmask     # [T, C]

        # per-head-block softmax; the per-ROW max shift cancels exactly in the per-BLOCK
        # normalization (exp underflow only for the -1e9 / -1e4 masked entries).
        m = jnp.max(s, axis=-1, keepdims=True)
        e = jnp.exp(s - m)
        denom = jnp.dot(e, blockones, preferred_element_type=jnp.float32)        # [T, C]
        p = e / denom                                                             # exact division

        # context + output projection fused: attn = sum_h P_h @ (V_h @ Wo_h)
        u = jnp.dot(vexp.astype(bf16), whh_ref[3 * n_layers + l],
                    preferred_element_type=jnp.float32)                           # [C, H]
        attn = jnp.dot(p, u, preferred_element_type=jnp.float32) + vec(b0 + 3)    # [T, H]
        h = _layer_norm(attn + h, vec(b0 + 4), vec(b0 + 5))

        # feed-forward + fused residual + LayerNorm
        ffn1 = jnp.dot(h.astype(bf16), whi_ref[l],
                       preferred_element_type=jnp.float32) + vec(b0 + 6, inter)
        ffn1 = _gelu(ffn1)
        ffn2 = jnp.dot(ffn1.astype(bf16), wih_ref[l],
                       preferred_element_type=jnp.float32) + vec(b0 + 7)
        h = _layer_norm(ffn2 + h, vec(b0 + 8), vec(b0 + 9))

    # ---- pooler on the CLS token via a selection-matrix matmul (idle MXU, no row gather) ----
    cls_tok = jnp.dot(sel, h, preferred_element_type=jnp.float32)                 # [B, H]
    pooled = jnp.tanh(
        jnp.dot(cls_tok.astype(bf16), whh_ref[4 * n_layers],
                preferred_element_type=jnp.float32) + vec(off["pool_b"]))

    # ---- classifier head (lane-dense, padded to CPAD) + cross-entropy ----
    # pad classes carry a -1e9 bias so exp() underflows to 0 and the loss is exact.
    logits = jnp.dot(pooled.astype(bf16), wcls_ref[...],
                     preferred_element_type=jnp.float32) + vec(off["cls_b"], CPAD)  # [B, 128]
    out_ref[0:batch, :] = logits

    m2 = jnp.max(logits, axis=-1, keepdims=True)
    lse = m2 + jnp.log(jnp.sum(jnp.exp(logits - m2), axis=-1, keepdims=True))       # [B, 1]
    nll = lse - jnp.sum(onehot * logits, axis=-1, keepdims=True)                     # [B, 1]
    loss11 = jnp.sum(nll, axis=0, keepdims=True) * (1.0 / batch)                     # [1, 1]
    # fold the scalar loss into the spare rows of the lane-dense output slab
    out_ref[batch:, :] = jnp.broadcast_to(loss11, (out_rows - batch, CPAD))


# -------------------------------- parameter construction -------------------------------
def init_params(key):
    def nrm(k, shape):
        return jax.random.normal(k, shape, dtype=jnp.float32) * 0.02

    keys = iter(jax.random.split(key, 256))
    p = {
        "word_emb": nrm(next(keys), (VOCAB_SIZE, HIDDEN)),
        "pos_emb": nrm(next(keys), (MAX_POS, HIDDEN)),
        "type_emb": nrm(next(keys), (TYPE_VOCAB_SIZE, HIDDEN)),
        "emb_ln_g": jnp.ones((HIDDEN,), jnp.float32),
        "emb_ln_b": jnp.zeros((HIDDEN,), jnp.float32),
        "layers": [],
        "pooler_w": nrm(next(keys), (HIDDEN, HIDDEN)),
        "pooler_b": jnp.zeros((HIDDEN,), jnp.float32),
        "cls_w": nrm(next(keys), (HIDDEN, N_CLASSES)),
        "cls_b": jnp.zeros((N_CLASSES,), jnp.float32),
    }
    for _ in range(NUM_LAYERS):
        p["layers"].append({
            "wq": nrm(next(keys), (HIDDEN, HIDDEN)), "bq": jnp.zeros((HIDDEN,), jnp.float32),
            "wk": nrm(next(keys), (HIDDEN, HIDDEN)), "bk": jnp.zeros((HIDDEN,), jnp.float32),
            "wv": nrm(next(keys), (HIDDEN, HIDDEN)), "bv": jnp.zeros((HIDDEN,), jnp.float32),
            "wo": nrm(next(keys), (HIDDEN, HIDDEN)), "bo": jnp.zeros((HIDDEN,), jnp.float32),
            "attn_ln_g": jnp.ones((HIDDEN,), jnp.float32),
            "attn_ln_b": jnp.zeros((HIDDEN,), jnp.float32),
            "wi": nrm(next(keys), (HIDDEN, INTERMEDIATE)),
            "bi": jnp.zeros((INTERMEDIATE,), jnp.float32),
            "wf": nrm(next(keys), (INTERMEDIATE, HIDDEN)),
            "bf": jnp.zeros((HIDDEN,), jnp.float32),
            "ffn_ln_g": jnp.ones((HIDDEN,), jnp.float32),
            "ffn_ln_b": jnp.zeros((HIDDEN,), jnp.float32),
        })
    return p


def pack_params(params):
    """Stack all [H,H]-shaped weights, FFN weights and classifier into bf16 MXU-operand slabs."""
    Ls = params["layers"]
    whh = jnp.stack(
        [L["wq"] for L in Ls] + [L["wk"] for L in Ls] + [L["wv"] for L in Ls]
        + [L["wo"] for L in Ls] + [params["pooler_w"]]
    ).astype(jnp.bfloat16)                                                   # [4L+1, H, H]
    whi = jnp.stack([L["wi"] for L in Ls]).astype(jnp.bfloat16)              # [L, H, I]
    wih = jnp.stack([L["wf"] for L in Ls]).astype(jnp.bfloat16)              # [L, I, H]
    wcls = (jnp.zeros((HIDDEN, CPAD), jnp.float32)
            .at[:, :N_CLASSES].set(params["cls_w"])).astype(jnp.bfloat16)    # [H, CPAD]
    return whh, whi, wih, wcls


def _build_slab(params, attention_mask, cate, batch, seq, off):
    """Pack every small vector + runtime mask/one-hot + constant matrices into one f32 slab."""
    T = batch * seq
    C = NUM_HEADS * T
    slab = jnp.zeros((off["rows"], SLAB_W), jnp.float32)

    def set_row(s, r, v):
        v = jnp.asarray(v, jnp.float32).reshape(-1)
        return s.at[r, :v.shape[0]].set(v)

    def set_block(s, r, m):
        m = jnp.asarray(m, jnp.float32)
        return s.at[r:r + m.shape[0], :m.shape[1]].set(m)

    slab = set_row(slab, off["emb_ln_g"], params["emb_ln_g"])
    slab = set_row(slab, off["emb_ln_b"], params["emb_ln_b"])
    names = ["bq", "bk", "bv", "bo", "attn_ln_g", "attn_ln_b", "bi", "bf", "ffn_ln_g", "ffn_ln_b"]
    for l, L in enumerate(params["layers"]):
        b0 = off["layers"] + 10 * l
        for i, name in enumerate(names):
            slab = set_row(slab, b0 + i, L[name])
    slab = set_row(slab, off["pool_b"], params["pooler_b"])
    cls_b_pad = jnp.full((CPAD,), -1e9, jnp.float32).at[:N_CLASSES].set(params["cls_b"])
    slab = set_row(slab, off["cls_b"], cls_b_pad)

    onehot = jax.nn.one_hot(cate, N_CLASSES, dtype=jnp.float32)
    onehot_pad = jnp.zeros((batch, CPAD), jnp.float32).at[:, :N_CLASSES].set(onehot)
    slab = set_block(slab, off["onehot"], onehot_pad)

    # CLS-token selection matrix [B, T]
    sel = (jnp.arange(T)[None, :] == (jnp.arange(batch) * seq)[:, None]).astype(jnp.float32)
    slab = set_block(slab, off["sel"], sel)

    # additive attention mask [T, nh*T]: HF-style -10000*(1-mask) per key, -1e9 across batches
    tok = jnp.arange(T)
    bq = tok // seq
    bk = tok // seq
    key_mask = (1.0 - attention_mask.astype(jnp.float32)).reshape(T) * -10000.0
    base_mask = jnp.where(bq[:, None] == bk[None, :], key_mask[None, :], -1e9)       # [T, T]
    addmask = jnp.tile(base_mask, (1, NUM_HEADS))                                    # [T, C]
    slab = set_block(slab, off["addmask"], addmask)

    # per-head replication / masking constants for the block-diagonal attention
    c = jnp.arange(C)
    rrep = (c[:, None] % T == jnp.arange(T)[None, :]).astype(jnp.float32)            # [C, T]
    headmask = ((c[:, None] // T) ==
                (jnp.arange(HIDDEN)[None, :] // HEAD_DIM)).astype(jnp.float32)       # [C, H]
    blockones = ((c[:, None] // T) == (c[None, :] // T)).astype(jnp.float32)         # [C, C]
    slab = set_block(slab, off["rrep"], rrep)
    slab = set_block(slab, off["headmask"], headmask)
    slab = set_block(slab, off["blockones"], blockones)
    return slab


# ------------------------------------ forward pass --------------------------------------
def classifier_forward(params, input_ids, attention_mask, token_type_ids, cate):
    B, S = input_ids.shape
    T = B * S
    off = _slab_layout(B, S)
    out_rows = max(8, _rup8(B + 1))

    # ---- embeddings (gathers are glue) ----
    emb = (
        jnp.take(params["word_emb"], input_ids, axis=0)
        + params["pos_emb"][jnp.arange(S)][None, :, :]
        + jnp.take(params["type_emb"], token_type_ids, axis=0)
    ).reshape(T, HIDDEN)

    whh, whi, wih, wcls = pack_params(params)
    slab = _build_slab(params, attention_mask, cate, B, S, off)

    kernel = functools.partial(
        _bert_fused_kernel,
        batch=B, seq=S, n_heads=NUM_HEADS, head_dim=HEAD_DIM, n_layers=NUM_LAYERS,
        inter=INTERMEDIATE, scale=1.0 / (HEAD_DIM ** 0.5), off=off, out_rows=out_rows)

    out = pl.pallas_call(
        kernel,
        out_shape=jax.ShapeDtypeStruct((out_rows, CPAD), jnp.float32),
        in_specs=[_VMEM] * 6,
        out_specs=_VMEM,
    )(emb, whh, whi, wih, wcls, slab)

    logits = out[:B, :N_CLASSES]       # slice real classes out of the lane-dense slab
    loss = out[B, 0]                   # loss was folded into the first spare row
    return {"loss": loss, "logits": logits}


# ----------------------------------------- main ------------------------------------------
if __name__ == "__main__":
    key = jax.random.PRNGKey(0)
    k_params, k_ids, k_mask, k_type, k_lab = jax.random.split(key, 5)

    params = init_params(k_params)

    B, S = 2, 8
    input_ids = jax.random.randint(k_ids, (B, S), 0, VOCAB_SIZE, dtype=jnp.int32)
    attention_mask = jnp.ones((B, S), dtype=jnp.int32)
    token_type_ids = jnp.zeros((B, S), dtype=jnp.int32)
    cate = jax.random.randint(k_lab, (B,), 0, N_CLASSES, dtype=jnp.int32)

    out = classifier_forward(params, input_ids, attention_mask, token_type_ids, cate)
    jax.block_until_ready(out)
    assert out["logits"].shape == (B, N_CLASSES)
    assert out["loss"].shape == ()
    print("KERNEL_OK")
</pallas_src>

<mosaic_0001>
module attributes {stable_mosaic.version = 11 : i64} {
  func.func @_bert_fused_kernel(%arg0: memref<16x32xf32, #tpu.memory_space<vmem>>, %arg1: memref<9x32x32xbf16, #tpu.memory_space<vmem>>, %arg2: memref<2x32x64xbf16, #tpu.memory_space<vmem>>, %arg3: memref<2x64x32xbf16, #tpu.memory_space<vmem>>, %arg4: memref<32x128xbf16, #tpu.memory_space<vmem>>, %arg5: memref<248x128xf32, #tpu.memory_space<vmem>>, %arg6: memref<8x128xf32, #tpu.memory_space<vmem>>) attributes {dimension_semantics = [], scalar_prefetch = 0 : i64, scratch_operands = 0 : i64, tpu.core_type = #tpu.core_type<tc>} {
    %c40 = arith.constant 40 : index
    %c0 = arith.constant 0 : index
    %0 = vector.load %arg5[%c40, %c0] : memref<248x128xf32, #tpu.memory_space<vmem>>, vector<16x64xf32>
    %c56 = arith.constant 56 : index
    %c0_0 = arith.constant 0 : index
    %1 = vector.load %arg5[%c56, %c0_0] : memref<248x128xf32, #tpu.memory_space<vmem>>, vector<64x16xf32>
    %c120 = arith.constant 120 : index
    %c0_1 = arith.constant 0 : index
    %2 = vector.load %arg5[%c120, %c0_1] : memref<248x128xf32, #tpu.memory_space<vmem>>, vector<64x32xf32>
    %c184 = arith.constant 184 : index
    %c0_2 = arith.constant 0 : index
    %3 = vector.load %arg5[%c184, %c0_2] : memref<248x128xf32, #tpu.memory_space<vmem>>, vector<64x64xf32>
    %c32 = arith.constant 32 : index
    %c0_3 = arith.constant 0 : index
    %4 = vector.load %arg5[%c32, %c0_3] : memref<248x128xf32, #tpu.memory_space<vmem>>, vector<2x16xf32>
    %c24 = arith.constant 24 : index
    %c0_4 = arith.constant 0 : index
    %5 = vector.load %arg5[%c24, %c0_4] : memref<248x128xf32, #tpu.memory_space<vmem>>, vector<2x128xf32>
    %c0_5 = arith.constant 0 : index
    %c0_6 = arith.constant 0 : index
    %6 = vector.load %arg0[%c0_5, %c0_6] : memref<16x32xf32, #tpu.memory_space<vmem>>, vector<16x32xf32>
    %c0_7 = arith.constant 0 : index
    %c0_8 = arith.constant 0 : index
    %7 = vector.load %arg5[%c0_7, %c0_8] : memref<248x128xf32, #tpu.memory_space<vmem>>, vector<1x32xf32>
    %c1 = arith.constant 1 : index
    %c0_9 = arith.constant 0 : index
    %8 = vector.load %arg5[%c1, %c0_9] : memref<248x128xf32, #tpu.memory_space<vmem>>, vector<1x32xf32>
    %cst = arith.constant dense<0.000000e+00> : vector<16xf32>
    %9 = vector.multi_reduction <add>, %6, %cst [1] : vector<16x32xf32> to vector<16xf32>
    %10 = vector.shape_cast %9 : vector<16xf32> to vector<16x1xf32>
    %cst_10 = arith.constant 3.200000e+01 : f32
    %11 = vector.broadcast %cst_10 : f32 to vector<16x1xf32>
    %12 = arith.divf %10, %11 : vector<16x1xf32>
    %13 = vector.broadcast %12 : vector<16x1xf32> to vector<16x32xf32>
    %14 = arith.subf %6, %13 : vector<16x32xf32>
    %15 = arith.mulf %14, %14 : vector<16x32xf32>
    %cst_11 = arith.constant dense<0.000000e+00> : vector<16xf32>
    %16 = vector.multi_reduction <add>, %15, %cst_11 [1] : vector<16x32xf32> to vector<16xf32>
    %17 = vector.shape_cast %16 : vector<16xf32> to vector<16x1xf32>
    %cst_12 = arith.constant 3.200000e+01 : f32
    %18 = vector.broadcast %cst_12 : f32 to vector<16x1xf32>
    %19 = arith.divf %17, %18 : vector<16x1xf32>
    %cst_13 = arith.constant 9.99999996E-13 : f32
    %20 = vector.broadcast %cst_13 : f32 to vector<16x1xf32>
    %21 = arith.addf %19, %20 : vector<16x1xf32>
    %22 = math.rsqrt %21 : vector<16x1xf32>
    %23 = vector.broadcast %22 : vector<16x1xf32> to vector<16x32xf32>
    %24 = arith.mulf %14, %23 : vector<16x32xf32>
    %25 = vector.broadcast %7 : vector<1x32xf32> to vector<16x32xf32>
    %26 = arith.mulf %24, %25 : vector<16x32xf32>
    %27 = vector.broadcast %8 : vector<1x32xf32> to vector<16x32xf32>
    %28 = arith.addf %26, %27 : vector<16x32xf32>
    %29 = arith.truncf %28 : vector<16x32xf32> to vector<16x32xbf16>
    %c0_14 = arith.constant 0 : index
    %c0_15 = arith.constant 0 : index
    %c0_16 = arith.constant 0 : index
    %30 = vector.load %arg1[%c0_14, %c0_15, %c0_16] : memref<9x32x32xbf16, #tpu.memory_space<vmem>>, vector<1x32x32xbf16>
    %31 = vector.shape_cast %30 : vector<1x32x32xbf16> to vector<32x32xbf16>
    %cst_17 = arith.constant dense<0.000000e+00> : vector<16x32xf32>
    %32 = tpu.matmul %29, %31, %cst_17 {dimension_numbers = #tpu.dot_dimension_numbers<[1], [0], [0], [1], [0, 0, 1, 1], [], []>} : vector<16x32xbf16>, vector<32x32xbf16>, vector<16x32xf32> -> vector<16x32xf32>
    %c2 = arith.constant 2 : index
    %c0_18 = arith.constant 0 : index
    %33 = vector.load %arg5[%c2, %c0_18] : memref<248x128xf32, #tpu.memory_space<vmem>>, vector<1x32xf32>
    %34 = vector.broadcast %33 : vector<1x32xf32> to vector<16x32xf32>
    %35 = arith.addf %32, %34 : vector<16x32xf32>
    %c2_19 = arith.constant 2 : index
    %c0_20 = arith.constant 0 : index
    %c0_21 = arith.constant 0 : index
    %36 = vector.load %arg1[%c2_19, %c0_20, %c0_21] : memref<9x32x32xbf16, #tpu.memory_space<vmem>>, vector<1x32x32xbf16>
    %37 = vector.shape_cast %36 : vector<1x32x32xbf16> to vector<32x32xbf16>
    %cst_22 = arith.constant dense<0.000000e+00> : vector<16x32xf32>
    %38 = tpu.matmul %29, %37, %cst_22 {dimension_numbers = #tpu.dot_dimension_numbers<[1], [0], [0], [1], [0, 0, 1, 1], [], []>} : vector<16x32xbf16>, vector<32x32xbf16>, vector<16x32xf32> -> vector<16x32xf32>
    %c3 = arith.constant 3 : index
    %c0_23 = arith.constant 0 : index
    %39 = vector.load %arg5[%c3, %c0_23] : memref<248x128xf32, #tpu.memory_space<vmem>>, vector<1x32xf32>
    %40 = vector.broadcast %39 : vector<1x32xf32> to vector<16x32xf32>
    %41 = arith.addf %38, %40 : vector<16x32xf32>
    %c4 = arith.constant 4 : index
    %c0_24 = arith.constant 0 : index
    %c0_25 = arith.constant 0 : index
    %42 = vector.load %arg1[%c4, %c0_24, %c0_25] : memref<9x32x32xbf16, #tpu.memory_space<vmem>>, vector<1x32x32xbf16>
    %43 = vector.shape_cast %42 : vector<1x32x32xbf16> to vector<32x32xbf16>
    %cst_26 = arith.constant dense<0.000000e+00> : vector<16x32xf32>
    %44 = tpu.matmul %29, %43, %cst_26 {dimension_numbers = #tpu.dot_dimension_numbers<[1], [0], [0], [1], [0, 0, 1, 1], [], []>} : vector<16x32xbf16>, vector<32x32xbf16>, vector<16x32xf32> -> vector<16x32xf32>
    %c4_27 = arith.constant 4 : index
    %c0_28 = arith.constant 0 : index
    %45 = vector.load %arg5[%c4_27, %c0_28] : memref<248x128xf32, #tpu.memory_space<vmem>>, vector<1x32xf32>
    %46 = vector.broadcast %45 : vector<1x32xf32> to vector<16x32xf32>
    %47 = arith.addf %44, %46 : vector<16x32xf32>
    %cst_29 = arith.constant dense<0.000000e+00> : vector<64x32xf32>
    %48 = tpu.matmul %1, %41, %cst_29 {dimension_numbers = #tpu.dot_dimension_numbers<[1], [0], [0], [1], [0, 0, 1, 1], [], []>} : vector<64x16xf32>, vector<16x32xf32>, vector<64x32xf32> -> vector<64x32xf32>
    %49 = arith.mulf %48, %2 : vector<64x32xf32>
    %cst_30 = arith.constant dense<0.000000e+00> : vector<64x32xf32>
    %50 = tpu.matmul %1, %47, %cst_30 {dimension_numbers = #tpu.dot_dimension_numbers<[1], [0], [0], [1], [0, 0, 1, 1], [], []>} : vector<64x16xf32>, vector<16x32xf32>, vector<64x32xf32> -> vector<64x32xf32>
    %51 = arith.mulf %50, %2 : vector<64x32xf32>
    "tpu.trace_start"() <{level = 10 : i32, message = "td,cd->tc"}> : () -> ()
    %cst_31 = arith.constant dense<0.000000e+00> : vector<16x64xf32>
    %52 = tpu.matmul %35, %49, %cst_31 {dimension_numbers = #tpu.dot_dimension_numbers<[1], [1], [0], [0], [0, 0, 1, 0], [], []>} : vector<16x32xf32>, vector<64x32xf32>, vector<16x64xf32> -> vector<16x64xf32>
    "tpu.trace_stop"() : () -> ()
    %cst_32 = arith.constant 0.353553385 : f32
    %53 = vector.broadcast %cst_32 : f32 to vector<16x64xf32>
    %54 = arith.mulf %52, %53 : vector<16x64xf32>
    %55 = arith.addf %54, %0 : vector<16x64xf32>
    %cst_33 = arith.constant dense<0xFF800000> : vector<16xf32>
    %56 = vector.multi_reduction <maximumf>, %55, %cst_33 [1] : vector<16x64xf32> to vector<16xf32>
    %57 = vector.shape_cast %56 : vector<16xf32> to vector<16x1xf32>
    %58 = vector.broadcast %57 : vector<16x1xf32> to vector<16x64xf32>
    %59 = arith.subf %55, %58 : vector<16x64xf32>
    %60 = math.exp %59 : vector<16x64xf32>
    %cst_34 = arith.constant dense<0.000000e+00> : vector<16x64xf32>
    %61 = tpu.matmul %60, %3, %cst_34 {dimension_numbers = #tpu.dot_dimension_numbers<[1], [0], [0], [1], [0, 0, 1, 1], [], []>} : vector<16x64xf32>, vector<64x64xf32>, vector<16x64xf32> -> vector<16x64xf32>
    %62 = arith.divf %60, %61 : vector<16x64xf32>
    %63 = arith.truncf %51 : vector<64x32xf32> to vector<64x32xbf16>
    %c6 = arith.constant 6 : index
    %c0_35 = arith.constant 0 : index
    %c0_36 = arith.constant 0 : index
    %64 = vector.load %arg1[%c6, %c0_35, %c0_36] : memref<9x32x32xbf16, #tpu.memory_space<vmem>>, vector<1x32x32xbf16>
    %65 = vector.shape_cast %64 : vector<1x32x32xbf16> to vector<32x32xbf16>
    %cst_37 = arith.constant dense<0.000000e+00> : vector<64x32xf32>
    %66 = tpu.matmul %63, %65, %cst_37 {dimension_numbers = #tpu.dot_dimension_numbers<[1], [0], [0], [1], [0, 0, 1, 1], [], []>} : vector<64x32xbf16>, vector<32x32xbf16>, vector<64x32xf32> -> vector<64x32xf32>
    %cst_38 = arith.constant dense<0.000000e+00> : vector<16x32xf32>
    %67 = tpu.matmul %62, %66, %cst_38 {dimension_numbers = #tpu.dot_dimension_numbers<[1], [0], [0], [1], [0, 0, 1, 1], [], []>} : vector<16x64xf32>, vector<64x32xf32>, vector<16x32xf32> -> vector<16x32xf32>
    %c5 = arith.constant 5 : index
    %c0_39 = arith.constant 0 : index
    %68 = vector.load %arg5[%c5, %c0_39] : memref<248x128xf32, #tpu.memory_space<vmem>>, vector<1x32xf32>
    %69 = vector.broadcast %68 : vector<1x32xf32> to vector<16x32xf32>
    %70 = arith.addf %67, %69 : vector<16x32xf32>
    %71 = arith.addf %70, %28 : vector<16x32xf32>
    %c6_40 = arith.constant 6 : index
    %c0_41 = arith.constant 0 : index
    %72 = vector.load %arg5[%c6_40, %c0_41] : memref<248x128xf32, #tpu.memory_space<vmem>>, vector<1x32xf32>
    %c7 = arith.constant 7 : index
    %c0_42 = arith.constant 0 : index
    %73 = vector.load %arg5[%c7, %c0_42] : memref<248x128xf32, #tpu.memory_space<vmem>>, vector<1x32xf32>
    %cst_43 = arith.constant dense<0.000000e+00> : vector<16xf32>
    %74 = vector.multi_reduction <add>, %71, %cst_43 [1] : vector<16x32xf32> to vector<16xf32>
    %75 = vector.shape_cast %74 : vector<16xf32> to vector<16x1xf32>
    %cst_44 = arith.constant 3.200000e+01 : f32
    %76 = vector.broadcast %cst_44 : f32 to vector<16x1xf32>
    %77 = arith.divf %75, %76 : vector<16x1xf32>
    %78 = vector.broadcast %77 : vector<16x1xf32> to vector<16x32xf32>
    %79 = arith.subf %71, %78 : vector<16x32xf32>
    %80 = arith.mulf %79, %79 : vector<16x32xf32>
    %cst_45 = arith.constant dense<0.000000e+00> : vector<16xf32>
    %81 = vector.multi_reduction <add>, %80, %cst_45 [1] : vector<16x32xf32> to vector<16xf32>
    %82 = vector.shape_cast %81 : vector<16xf32> to vector<16x1xf32>
    %cst_46 = arith.constant 3.200000e+01 : f32
    %83 = vector.broadcast %cst_46 : f32 to vector<16x1xf32>
    %84 = arith.divf %82, %83 : vector<16x1xf32>
    %cst_47 = arith.constant 9.99999996E-13 : f32
    %85 = vector.broadcast %cst_47 : f32 to vector<16x1xf32>
    %86 = arith.addf %84, %85 : vector<16x1xf32>
    %87 = math.rsqrt %86 : vector<16x1xf32>
    %88 = vector.broadcast %87 : vector<16x1xf32> to vector<16x32xf32>
    %89 = arith.mulf %79, %88 : vector<16x32xf32>
    %90 = vector.broadcast %72 : vector<1x32xf32> to vector<16x32xf32>
    %91 = arith.mulf %89, %90 : vector<16x32xf32>
    %92 = vector.broadcast %73 : vector<1x32xf32> to vector<16x32xf32>
    %93 = arith.addf %91, %92 : vector<16x32xf32>
    %94 = arith.truncf %93 : vector<16x32xf32> to vector<16x32xbf16>
    %c0_48 = arith.constant 0 : index
    %c0_49 = arith.constant 0 : index
    %c0_50 = arith.constant 0 : index
    %95 = vector.load %arg2[%c0_48, %c0_49, %c0_50] : memref<2x32x64xbf16, #tpu.memory_space<vmem>>, vector<1x32x64xbf16>
    %96 = vector.shape_cast %95 : vector<1x32x64xbf16> to vector<32x64xbf16>
    %cst_51 = arith.constant dense<0.000000e+00> : vector<16x64xf32>
    %97 = tpu.matmul %94, %96, %cst_51 {dimension_numbers = #tpu.dot_dimension_numbers<[1], [0], [0], [1], [0, 0, 1, 1], [], []>} : vector<16x32xbf16>, vector<32x64xbf16>, vector<16x64xf32> -> vector<16x64xf32>
    %c8 = arith.constant 8 : index
    %c0_52 = arith.constant 0 : index
    %98 = vector.load %arg5[%c8, %c0_52] : memref<248x128xf32, #tpu.memory_space<vmem>>, vector<1x64xf32>
    %99 = vector.broadcast %98 : vector<1x64xf32> to vector<16x64xf32>
    %100 = arith.addf %97, %99 : vector<16x64xf32>
    %cst_53 = arith.constant 5.000000e-01 : f32
    %101 = vector.broadcast %cst_53 : f32 to vector<16x64xf32>
    %102 = arith.mulf %101, %100 : vector<16x64xf32>
    %cst_54 = arith.constant 4.471500e-02 : f32
    %103 = vector.broadcast %cst_54 : f32 to vector<16x64xf32>
    %104 = arith.mulf %103, %100 : vector<16x64xf32>
    %105 = arith.mulf %104, %100 : vector<16x64xf32>
    %106 = arith.mulf %105, %100 : vector<16x64xf32>
    %107 = arith.addf %100, %106 : vector<16x64xf32>
    %cst_55 = arith.constant 0.797884583 : f32
    %108 = vector.broadcast %cst_55 : f32 to vector<16x64xf32>
    %109 = arith.mulf %108, %107 : vector<16x64xf32>
    %110 = math.tanh %109 : vector<16x64xf32>
    %cst_56 = arith.constant 1.000000e+00 : f32
    %111 = vector.broadcast %cst_56 : f32 to vector<16x64xf32>
    %112 = arith.addf %111, %110 : vector<16x64xf32>
    %113 = arith.mulf %102, %112 : vector<16x64xf32>
    %114 = arith.truncf %113 : vector<16x64xf32> to vector<16x64xbf16>
    %c0_57 = arith.constant 0 : index
    %c0_58 = arith.constant 0 : index
    %c0_59 = arith.constant 0 : index
    %115 = vector.load %arg3[%c0_57, %c0_58, %c0_59] : memref<2x64x32xbf16, #tpu.memory_space<vmem>>, vector<1x64x32xbf16>
    %116 = vector.shape_cast %115 : vector<1x64x32xbf16> to vector<64x32xbf16>
    %cst_60 = arith.constant dense<0.000000e+00> : vector<16x32xf32>
    %117 = tpu.matmul %114, %116, %cst_60 {dimension_numbers = #tpu.dot_dimension_numbers<[1], [0], [0], [1], [0, 0, 1, 1], [], []>} : vector<16x64xbf16>, vector<64x32xbf16>, vector<16x32xf32> -> vector<16x32xf32>
    %c9 = arith.constant 9 : index
    %c0_61 = arith.constant 0 : index
    %118 = vector.load %arg5[%c9, %c0_61] : memref<248x128xf32, #tpu.memory_space<vmem>>, vector<1x32xf32>
    %119 = vector.broadcast %118 : vector<1x32xf32> to vector<16x32xf32>
    %120 = arith.addf %117, %119 : vector<16x32xf32>
    %121 = arith.addf %120, %93 : vector<16x32xf32>
    %c10 = arith.constant 10 : index
    %c0_62 = arith.constant 0 : index
    %122 = vector.load %arg5[%c10, %c0_62] : memref<248x128xf32, #tpu.memory_space<vmem>>, vector<1x32xf32>
    %c11 = arith.constant 11 : index
    %c0_63 = arith.constant 0 : index
    %123 = vector.load %arg5[%c11, %c0_63] : memref<248x128xf32, #tpu.memory_space<vmem>>, vector<1x32xf32>
    %cst_64 = arith.constant dense<0.000000e+00> : vector<16xf32>
    %124 = vector.multi_reduction <add>, %121, %cst_64 [1] : vector<16x32xf32> to vector<16xf32>
    %125 = vector.shape_cast %124 : vector<16xf32> to vector<16x1xf32>
    %cst_65 = arith.constant 3.200000e+01 : f32
    %126 = vector.broadcast %cst_65 : f32 to vector<16x1xf32>
    %127 = arith.divf %125, %126 : vector<16x1xf32>
    %128 = vector.broadcast %127 : vector<16x1xf32> to vector<16x32xf32>
    %129 = arith.subf %121, %128 : vector<16x32xf32>
    %130 = arith.mulf %129, %129 : vector<16x32xf32>
    %cst_66 = arith.constant dense<0.000000e+00> : vector<16xf32>
    %131 = vector.multi_reduction <add>, %130, %cst_66 [1] : vector<16x32xf32> to vector<16xf32>
    %132 = vector.shape_cast %131 : vector<16xf32> to vector<16x1xf32>
    %cst_67 = arith.constant 3.200000e+01 : f32
    %133 = vector.broadcast %cst_67 : f32 to vector<16x1xf32>
    %134 = arith.divf %132, %133 : vector<16x1xf32>
    %cst_68 = arith.constant 9.99999996E-13 : f32
    %135 = vector.broadcast %cst_68 : f32 to vector<16x1xf32>
    %136 = arith.addf %134, %135 : vector<16x1xf32>
    %137 = math.rsqrt %136 : vector<16x1xf32>
    %138 = vector.broadcast %137 : vector<16x1xf32> to vector<16x32xf32>
    %139 = arith.mulf %129, %138 : vector<16x32xf32>
    %140 = vector.broadcast %122 : vector<1x32xf32> to vector<16x32xf32>
    %141 = arith.mulf %139, %140 : vector<16x32xf32>
    %142 = vector.broadcast %123 : vector<1x32xf32> to vector<16x32xf32>
    %143 = arith.addf %141, %142 : vector<16x32xf32>
    %144 = arith.truncf %143 : vector<16x32xf32> to vector<16x32xbf16>
    %c1_69 = arith.constant 1 : index
    %c0_70 = arith.constant 0 : index
    %c0_71 = arith.constant 0 : index
    %145 = vector.load %arg1[%c1_69, %c0_70, %c0_71] : memref<9x32x32xbf16, #tpu.memory_space<vmem>>, vector<1x32x32xbf16>
    %146 = vector.shape_cast %145 : vector<1x32x32xbf16> to vector<32x32xbf16>
    %cst_72 = arith.constant dense<0.000000e+00> : vector<16x32xf32>
    %147 = tpu.matmul %144, %146, %cst_72 {dimension_numbers = #tpu.dot_dimension_numbers<[1], [0], [0], [1], [0, 0, 1, 1], [], []>} : vector<16x32xbf16>, vector<32x32xbf16>, vector<16x32xf32> -> vector<16x32xf32>
    %c12 = arith.constant 12 : index
    %c0_73 = arith.constant 0 : index
    %148 = vector.load %arg5[%c12, %c0_73] : memref<248x128xf32, #tpu.memory_space<vmem>>, vector<1x32xf32>
    %149 = vector.broadcast %148 : vector<1x32xf32> to vector<16x32xf32>
    %150 = arith.addf %147, %149 : vector<16x32xf32>
    %c3_74 = arith.constant 3 : index
    %c0_75 = arith.constant 0 : index
    %c0_76 = arith.constant 0 : index
    %151 = vector.load %arg1[%c3_74, %c0_75, %c0_76] : memref<9x32x32xbf16, #tpu.memory_space<vmem>>, vector<1x32x32xbf16>
    %152 = vector.shape_cast %151 : vector<1x32x32xbf16> to vector<32x32xbf16>
    %cst_77 = arith.constant dense<0.000000e+00> : vector<16x32xf32>
    %153 = tpu.matmul %144, %152, %cst_77 {dimension_numbers = #tpu.dot_dimension_numbers<[1], [0], [0], [1], [0, 0, 1, 1], [], []>} : vector<16x32xbf16>, vector<32x32xbf16>, vector<16x32xf32> -> vector<16x32xf32>
    %c13 = arith.constant 13 : index
    %c0_78 = arith.constant 0 : index
    %154 = vector.load %arg5[%c13, %c0_78] : memref<248x128xf32, #tpu.memory_space<vmem>>, vector<1x32xf32>
    %155 = vector.broadcast %154 : vector<1x32xf32> to vector<16x32xf32>
    %156 = arith.addf %153, %155 : vector<16x32xf32>
    %c5_79 = arith.constant 5 : index
    %c0_80 = arith.constant 0 : index
    %c0_81 = arith.constant 0 : index
    %157 = vector.load %arg1[%c5_79, %c0_80, %c0_81] : memref<9x32x32xbf16, #tpu.memory_space<vmem>>, vector<1x32x32xbf16>
    %158 = vector.shape_cast %157 : vector<1x32x32xbf16> to vector<32x32xbf16>
    %cst_82 = arith.constant dense<0.000000e+00> : vector<16x32xf32>
    %159 = tpu.matmul %144, %158, %cst_82 {dimension_numbers = #tpu.dot_dimension_numbers<[1], [0], [0], [1], [0, 0, 1, 1], [], []>} : vector<16x32xbf16>, vector<32x32xbf16>, vector<16x32xf32> -> vector<16x32xf32>
    %c14 = arith.constant 14 : index
    %c0_83 = arith.constant 0 : index
    %160 = vector.load %arg5[%c14, %c0_83] : memref<248x128xf32, #tpu.memory_space<vmem>>, vector<1x32xf32>
    %161 = vector.broadcast %160 : vector<1x32xf32> to vector<16x32xf32>
    %162 = arith.addf %159, %161 : vector<16x32xf32>
    %cst_84 = arith.constant dense<0.000000e+00> : vector<64x32xf32>
    %163 = tpu.matmul %1, %156, %cst_84 {dimension_numbers = #tpu.dot_dimension_numbers<[1], [0], [0], [1], [0, 0, 1, 1], [], []>} : vector<64x16xf32>, vector<16x32xf32>, vector<64x32xf32> -> vector<64x32xf32>
    %164 = arith.mulf %163, %2 : vector<64x32xf32>
    %cst_85 = arith.constant dense<0.000000e+00> : vector<64x32xf32>
    %165 = tpu.matmul %1, %162, %cst_85 {dimension_numbers = #tpu.dot_dimension_numbers<[1], [0], [0], [1], [0, 0, 1, 1], [], []>} : vector<64x16xf32>, vector<16x32xf32>, vector<64x32xf32> -> vector<64x32xf32>
    %166 = arith.mulf %165, %2 : vector<64x32xf32>
    "tpu.trace_start"() <{level = 10 : i32, message = "td,cd->tc"}> : () -> ()
    %cst_86 = arith.constant dense<0.000000e+00> : vector<16x64xf32>
    %167 = tpu.matmul %150, %164, %cst_86 {dimension_numbers = #tpu.dot_dimension_numbers<[1], [1], [0], [0], [0, 0, 1, 0], [], []>} : vector<16x32xf32>, vector<64x32xf32>, vector<16x64xf32> -> vector<16x64xf32>
    "tpu.trace_stop"() : () -> ()
    %cst_87 = arith.constant 0.353553385 : f32
    %168 = vector.broadcast %cst_87 : f32 to vector<16x64xf32>
    %169 = arith.mulf %167, %168 : vector<16x64xf32>
    %170 = arith.addf %169, %0 : vector<16x64xf32>
    %cst_88 = arith.constant dense<0xFF800000> : vector<16xf32>
    %171 = vector.multi_reduction <maximumf>, %170, %cst_88 [1] : vector<16x64xf32> to vector<16xf32>
    %172 = vector.shape_cast %171 : vector<16xf32> to vector<16x1xf32>
    %173 = vector.broadcast %172 : vector<16x1xf32> to vector<16x64xf32>
    %174 = arith.subf %170, %173 : vector<16x64xf32>
    %175 = math.exp %174 : vector<16x64xf32>
    %cst_89 = arith.constant dense<0.000000e+00> : vector<16x64xf32>
    %176 = tpu.matmul %175, %3, %cst_89 {dimension_numbers = #tpu.dot_dimension_numbers<[1], [0], [0], [1], [0, 0, 1, 1], [], []>} : vector<16x64xf32>, vector<64x64xf32>, vector<16x64xf32> -> vector<16x64xf32>
    %177 = arith.divf %175, %176 : vector<16x64xf32>
    %178 = arith.truncf %166 : vector<64x32xf32> to vector<64x32xbf16>
    %c7_90 = arith.constant 7 : index
    %c0_91 = arith.constant 0 : index
    %c0_92 = arith.constant 0 : index
    %179 = vector.load %arg1[%c7_90, %c0_91, %c0_92] : memref<9x32x32xbf16, #tpu.memory_space<vmem>>, vector<1x32x32xbf16>
    %180 = vector.shape_cast %179 : vector<1x32x32xbf16> to vector<32x32xbf16>
    %cst_93 = arith.constant dense<0.000000e+00> : vector<64x32xf32>
    %181 = tpu.matmul %178, %180, %cst_93 {dimension_numbers = #tpu.dot_dimension_numbers<[1], [0], [0], [1], [0, 0, 1, 1], [], []>} : vector<64x32xbf16>, vector<32x32xbf16>, vector<64x32xf32> -> vector<64x32xf32>
    %cst_94 = arith.constant dense<0.000000e+00> : vector<16x32xf32>
    %182 = tpu.matmul %177, %181, %cst_94 {dimension_numbers = #tpu.dot_dimension_numbers<[1], [0], [0], [1], [0, 0, 1, 1], [], []>} : vector<16x64xf32>, vector<64x32xf32>, vector<16x32xf32> -> vector<16x32xf32>
    %c15 = arith.constant 15 : index
    %c0_95 = arith.constant 0 : index
    %183 = vector.load %arg5[%c15, %c0_95] : memref<248x128xf32, #tpu.memory_space<vmem>>, vector<1x32xf32>
    %184 = vector.broadcast %183 : vector<1x32xf32> to vector<16x32xf32>
    %185 = arith.addf %182, %184 : vector<16x32xf32>
    %186 = arith.addf %185, %143 : vector<16x32xf32>
    %c16 = arith.constant 16 : index
    %c0_96 = arith.constant 0 : index
    %187 = vector.load %arg5[%c16, %c0_96] : memref<248x128xf32, #tpu.memory_space<vmem>>, vector<1x32xf32>
    %c17 = arith.constant 17 : index
    %c0_97 = arith.constant 0 : index
    %188 = vector.load %arg5[%c17, %c0_97] : memref<248x128xf32, #tpu.memory_space<vmem>>, vector<1x32xf32>
    %cst_98 = arith.constant dense<0.000000e+00> : vector<16xf32>
    %189 = vector.multi_reduction <add>, %186, %cst_98 [1] : vector<16x32xf32> to vector<16xf32>
    %190 = vector.shape_cast %189 : vector<16xf32> to vector<16x1xf32>
    %cst_99 = arith.constant 3.200000e+01 : f32
    %191 = vector.broadcast %cst_99 : f32 to vector<16x1xf32>
    %192 = arith.divf %190, %191 : vector<16x1xf32>
    %193 = vector.broadcast %192 : vector<16x1xf32> to vector<16x32xf32>
    %194 = arith.subf %186, %193 : vector<16x32xf32>
    %195 = arith.mulf %194, %194 : vector<16x32xf32>
    %cst_100 = arith.constant dense<0.000000e+00> : vector<16xf32>
    %196 = vector.multi_reduction <add>, %195, %cst_100 [1] : vector<16x32xf32> to vector<16xf32>
    %197 = vector.shape_cast %196 : vector<16xf32> to vector<16x1xf32>
    %cst_101 = arith.constant 3.200000e+01 : f32
    %198 = vector.broadcast %cst_101 : f32 to vector<16x1xf32>
    %199 = arith.divf %197, %198 : vector<16x1xf32>
    %cst_102 = arith.constant 9.99999996E-13 : f32
    %200 = vector.broadcast %cst_102 : f32 to vector<16x1xf32>
    %201 = arith.addf %199, %200 : vector<16x1xf32>
    %202 = math.rsqrt %201 : vector<16x1xf32>
    %203 = vector.broadcast %202 : vector<16x1xf32> to vector<16x32xf32>
    %204 = arith.mulf %194, %203 : vector<16x32xf32>
    %205 = vector.broadcast %187 : vector<1x32xf32> to vector<16x32xf32>
    %206 = arith.mulf %204, %205 : vector<16x32xf32>
    %207 = vector.broadcast %188 : vector<1x32xf32> to vector<16x32xf32>
    %208 = arith.addf %206, %207 : vector<16x32xf32>
    %209 = arith.truncf %208 : vector<16x32xf32> to vector<16x32xbf16>
    %c1_103 = arith.constant 1 : index
    %c0_104 = arith.constant 0 : index
    %c0_105 = arith.constant 0 : index
    %210 = vector.load %arg2[%c1_103, %c0_104, %c0_105] : memref<2x32x64xbf16, #tpu.memory_space<vmem>>, vector<1x32x64xbf16>
    %211 = vector.shape_cast %210 : vector<1x32x64xbf16> to vector<32x64xbf16>
    %cst_106 = arith.constant dense<0.000000e+00> : vector<16x64xf32>
    %212 = tpu.matmul %209, %211, %cst_106 {dimension_numbers = #tpu.dot_dimension_numbers<[1], [0], [0], [1], [0, 0, 1, 1], [], []>} : vector<16x32xbf16>, vector<32x64xbf16>, vector<16x64xf32> -> vector<16x64xf32>
    %c18 = arith.constant 18 : index
    %c0_107 = arith.constant 0 : index
    %213 = vector.load %arg5[%c18, %c0_107] : memref<248x128xf32, #tpu.memory_space<vmem>>, vector<1x64xf32>
    %214 = vector.broadcast %213 : vector<1x64xf32> to vector<16x64xf32>
    %215 = arith.addf %212, %214 : vector<16x64xf32>
    %cst_108 = arith.constant 5.000000e-01 : f32
    %216 = vector.broadcast %cst_108 : f32 to vector<16x64xf32>
    %217 = arith.mulf %216, %215 : vector<16x64xf32>
    %cst_109 = arith.constant 4.471500e-02 : f32
    %218 = vector.broadcast %cst_109 : f32 to vector<16x64xf32>
    %219 = arith.mulf %218, %215 : vector<16x64xf32>
    %220 = arith.mulf %219, %215 : vector<16x64xf32>
    %221 = arith.mulf %220, %215 : vector<16x64xf32>
    %222 = arith.addf %215, %221 : vector<16x64xf32>
    %cst_110 = arith.constant 0.797884583 : f32
    %223 = vector.broadcast %cst_110 : f32 to vector<16x64xf32>
    %224 = arith.mulf %223, %222 : vector<16x64xf32>
    %225 = math.tanh %224 : vector<16x64xf32>
    %cst_111 = arith.constant 1.000000e+00 : f32
    %226 = vector.broadcast %cst_111 : f32 to vector<16x64xf32>
    %227 = arith.addf %226, %225 : vector<16x64xf32>
    %228 = arith.mulf %217, %227 : vector<16x64xf32>
    %229 = arith.truncf %228 : vector<16x64xf32> to vector<16x64xbf16>
    %c1_112 = arith.constant 1 : index
    %c0_113 = arith.constant 0 : index
    %c0_114 = arith.constant 0 : index
    %230 = vector.load %arg3[%c1_112, %c0_113, %c0_114] : memref<2x64x32xbf16, #tpu.memory_space<vmem>>, vector<1x64x32xbf16>
    %231 = vector.shape_cast %230 : vector<1x64x32xbf16> to vector<64x32xbf16>
    %cst_115 = arith.constant dense<0.000000e+00> : vector<16x32xf32>
    %232 = tpu.matmul %229, %231, %cst_115 {dimension_numbers = #tpu.dot_dimension_numbers<[1], [0], [0], [1], [0, 0, 1, 1], [], []>} : vector<16x64xbf16>, vector<64x32xbf16>, vector<16x32xf32> -> vector<16x32xf32>
    %c19 = arith.constant 19 : index
    %c0_116 = arith.constant 0 : index
    %233 = vector.load %arg5[%c19, %c0_116] : memref<248x128xf32, #tpu.memory_space<vmem>>, vector<1x32xf32>
    %234 = vector.broadcast %233 : vector<1x32xf32> to vector<16x32xf32>
    %235 = arith.addf %232, %234 : vector<16x32xf32>
    %236 = arith.addf %235, %208 : vector<16x32xf32>
    %c20 = arith.constant 20 : index
    %c0_117 = arith.constant 0 : index
    %237 = vector.load %arg5[%c20, %c0_117] : memref<248x128xf32, #tpu.memory_space<vmem>>, vector<1x32xf32>
    %c21 = arith.constant 21 : index
    %c0_118 = arith.constant 0 : index
    %238 = vector.load %arg5[%c21, %c0_118] : memref<248x128xf32, #tpu.memory_space<vmem>>, vector<1x32xf32>
    %cst_119 = arith.constant dense<0.000000e+00> : vector<16xf32>
    %239 = vector.multi_reduction <add>, %236, %cst_119 [1] : vector<16x32xf32> to vector<16xf32>
    %240 = vector.shape_cast %239 : vector<16xf32> to vector<16x1xf32>
    %cst_120 = arith.constant 3.200000e+01 : f32
    %241 = vector.broadcast %cst_120 : f32 to vector<16x1xf32>
    %242 = arith.divf %240, %241 : vector<16x1xf32>
    %243 = vector.broadcast %242 : vector<16x1xf32> to vector<16x32xf32>
    %244 = arith.subf %236, %243 : vector<16x32xf32>
    %245 = arith.mulf %244, %244 : vector<16x32xf32>
    %cst_121 = arith.constant dense<0.000000e+00> : vector<16xf32>
    %246 = vector.multi_reduction <add>, %245, %cst_121 [1] : vector<16x32xf32> to vector<16xf32>
    %247 = vector.shape_cast %246 : vector<16xf32> to vector<16x1xf32>
    %cst_122 = arith.constant 3.200000e+01 : f32
    %248 = vector.broadcast %cst_122 : f32 to vector<16x1xf32>
    %249 = arith.divf %247, %248 : vector<16x1xf32>
    %cst_123 = arith.constant 9.99999996E-13 : f32
    %250 = vector.broadcast %cst_123 : f32 to vector<16x1xf32>
    %251 = arith.addf %249, %250 : vector<16x1xf32>
    %252 = math.rsqrt %251 : vector<16x1xf32>
    %253 = vector.broadcast %252 : vector<16x1xf32> to vector<16x32xf32>
    %254 = arith.mulf %244, %253 : vector<16x32xf32>
    %255 = vector.broadcast %237 : vector<1x32xf32> to vector<16x32xf32>
    %256 = arith.mulf %254, %255 : vector<16x32xf32>
    %257 = vector.broadcast %238 : vector<1x32xf32> to vector<16x32xf32>
    %258 = arith.addf %256, %257 : vector<16x32xf32>
    %cst_124 = arith.constant dense<0.000000e+00> : vector<2x32xf32>
    %259 = tpu.matmul %4, %258, %cst_124 {dimension_numbers = #tpu.dot_dimension_numbers<[1], [0], [0], [1], [0, 0, 1, 1], [], []>} : vector<2x16xf32>, vector<16x32xf32>, vector<2x32xf32> -> vector<2x32xf32>
    %260 = arith.truncf %259 : vector<2x32xf32> to vector<2x32xbf16>
    %c8_125 = arith.constant 8 : index
    %c0_126 = arith.constant 0 : index
    %c0_127 = arith.constant 0 : index
    %261 = vector.load %arg1[%c8_125, %c0_126, %c0_127] : memref<9x32x32xbf16, #tpu.memory_space<vmem>>, vector<1x32x32xbf16>
    %262 = vector.shape_cast %261 : vector<1x32x32xbf16> to vector<32x32xbf16>
    %cst_128 = arith.constant dense<0.000000e+00> : vector<2x32xf32>
    %263 = tpu.matmul %260, %262, %cst_128 {dimension_numbers = #tpu.dot_dimension_numbers<[1], [0], [0], [1], [0, 0, 1, 1], [], []>} : vector<2x32xbf16>, vector<32x32xbf16>, vector<2x32xf32> -> vector<2x32xf32>
    %c22 = arith.constant 22 : index
    %c0_129 = arith.constant 0 : index
    %264 = vector.load %arg5[%c22, %c0_129] : memref<248x128xf32, #tpu.memory_space<vmem>>, vector<1x32xf32>
    %265 = vector.broadcast %264 : vector<1x32xf32> to vector<2x32xf32>
    %266 = arith.addf %263, %265 : vector<2x32xf32>
    %267 = math.tanh %266 : vector<2x32xf32>
    %268 = arith.truncf %267 : vector<2x32xf32> to vector<2x32xbf16>
    %c0_130 = arith.constant 0 : index
    %c0_131 = arith.constant 0 : index
    %269 = vector.load %arg4[%c0_130, %c0_131] : memref<32x128xbf16, #tpu.memory_space<vmem>>, vector<32x128xbf16>
    %cst_132 = arith.constant dense<0.000000e+00> : vector<2x128xf32>
    %270 = tpu.matmul %268, %269, %cst_132 {dimension_numbers = #tpu.dot_dimension_numbers<[1], [0], [0], [1], [0, 0, 1, 1], [], []>} : vector<2x32xbf16>, vector<32x128xbf16>, vector<2x128xf32> -> vector<2x128xf32>
    %c23 = arith.constant 23 : index
    %c0_133 = arith.constant 0 : index
    %271 = vector.load %arg5[%c23, %c0_133] : memref<248x128xf32, #tpu.memory_space<vmem>>, vector<1x128xf32>
    %272 = vector.broadcast %271 : vector<1x128xf32> to vector<2x128xf32>
    %273 = arith.addf %270, %272 : vector<2x128xf32>
    %c0_134 = arith.constant 0 : index
    %c0_135 = arith.constant 0 : index
    %274 = vector.load %arg6[%c0_134, %c0_135] : memref<8x128xf32, #tpu.memory_space<vmem>>, vector<2x128xf32>
    tpu.vector_store %arg6[%c0_134, %c0_135], %273 {strides = array<i32>} : memref<8x128xf32, #tpu.memory_space<vmem>>, vector<2x128xf32>,
    %cst_136 = arith.constant dense<0xFF800000> : vector<2xf32>
    %275 = vector.multi_reduction <maximumf>, %273, %cst_136 [1] : vector<2x128xf32> to vector<2xf32>
    %276 = vector.shape_cast %275 : vector<2xf32> to vector<2x1xf32>
    %277 = vector.broadcast %276 : vector<2x1xf32> to vector<2x128xf32>
    %278 = arith.subf %273, %277 : vector<2x128xf32>
    %279 = math.exp %278 : vector<2x128xf32>
    %cst_137 = arith.constant dense<0.000000e+00> : vector<2xf32>
    %280 = vector.multi_reduction <add>, %279, %cst_137 [1] : vector<2x128xf32> to vector<2xf32>
    %281 = vector.shape_cast %280 : vector<2xf32> to vector<2x1xf32>
    %282 = math.log %281 : vector<2x1xf32>
    %283 = arith.addf %276, %282 : vector<2x1xf32>
    %284 = arith.mulf %5, %273 : vector<2x128xf32>
    %cst_138 = arith.constant dense<0.000000e+00> : vector<2xf32>
    %285 = vector.multi_reduction <add>, %284, %cst_138 [1] : vector<2x128xf32> to vector<2xf32>
    %286 = vector.shape_cast %285 : vector<2xf32> to vector<2x1xf32>
    %287 = arith.subf %283, %286 : vector<2x1xf32>
    %cst_139 = arith.constant dense<0.000000e+00> : vector<1xf32>
    %288 = vector.multi_reduction <add>, %287, %cst_139 [0] : vector<2x1xf32> to vector<1xf32>
    %289 = vector.shape_cast %288 : vector<1xf32> to vector<1x1xf32>
    %cst_140 = arith.constant 5.000000e-01 : f32
    %290 = vector.broadcast %cst_140 : f32 to vector<1x1xf32>
    %291 = arith.mulf %289, %290 : vector<1x1xf32>
    %292 = vector.shape_cast %291 : vector<1x1xf32> to vector<1x1xf32>
    %293 = vector.broadcast %292 : vector<1x1xf32> to vector<6x128xf32>
    %c2_141 = arith.constant 2 : index
    %c0_142 = arith.constant 0 : index
    %294 = vector.load %arg6[%c2_141, %c0_142] : memref<8x128xf32, #tpu.memory_space<vmem>>, vector<6x128xf32>
    tpu.vector_store %arg6[%c2_141, %c0_142], %293 {strides = array<i32>} : memref<8x128xf32, #tpu.memory_space<vmem>>, vector<6x128xf32>,
    return
  }
}

</mosaic_0001>

<bundles_post_ra>
// kernel: tpu_custom_call.1
= control target key start
LH: loop header
LB: loop body
LE: loop exit
PB: predicated region body
PF: predicated region fallthrough
CT: control target
= control target key end

     0   :  { %11 = vsyncpa [#allocation3], 0  ;;  %s2401_s0 = inlined_call_operand.vmem [shape: f32[16,32], index: 0, kind: input, shape index: {}]   ;;  %s2402_s1 = inlined_call_operand.hbm [shape: bf16[9,32,32], index: 1, kind: input, shape index: {}]   ;;  %s2403_s2 = inlined_call_operand.vmem [shape: bf16[2,32,64], index: 2, kind: input, shape index: {}]   ;;  %s2404_s3 = inlined_call_operand.vmem [shape: bf16[2,64,32], index: 3, kind: input, shape index: {}]   ;;  %s2405_s4 = inlined_call_operand.vmem [shape: bf16[32,128], index: 4, kind: input, shape index: {}]   ;;  %s2406_s5 = inlined_call_operand.hbm [shape: f32[248,128], index: 5, kind: input, shape index: {}]   ;;  %s2407_s6 = inlined_call_operand.hbm [shape: f32[8,128], index: 6, kind: output, shape index: {}]  }
   0x1   :  { %12 = vsyncpa [#allocation6], 0 }
   0x2   :  { %13 = vsyncpa [#allocation4], 0  ;;  %s20_s23 = sshll.u32 %s2402_s1, 4  ;;  %s2002_s24 = smov [#allocation2]   ;;  %s21_s23 = int_to_ptr.hbm [resolvable:$true] %s20_s23 }
   0x3   :  { %s22_s25 = sshll.u32 %s2002_s24, 4  ;;  %s39_s28 = sshll.u32 %s2406_s5, 4  ;;  %s23_s25 = int_to_ptr.vmem [resolvable:$true] %s22_s25  ;;  %s40_s28 = int_to_ptr.hbm [resolvable:$true] %s39_s28 }
   0x4   :  { %s2003_s29 = smov 64   ;;  %s2004_s30 = smov 4  }
   0x5   :  { %28 = dma.hbm_to_vmem [thread:$0]  %s21_s23, 2304, %s23_s25, [#allocation3], %s2003_s29, %s2003_s29, %s2004_s30  }
   0x6   :  { %s2005_s7 = smov [#allocation5]   ;;  %s2006_s9 = smov 128  }
   0x7   :  { %s41_s8 = sshll.u32 %s2005_s7, 4  ;;  %s2007_s10 = smov 8   ;;  %s42_s8 = int_to_ptr.vmem [resolvable:$true] %s41_s8 }
   0x8   :  { %47 = dma.hbm_to_vmem [thread:$0]  %s40_s28, 3968, %s42_s8, [#allocation6], %s2006_s9, %s2006_s9, %s2007_s10  }
   0x9   :  { %1996 = dma.done.wait [#allocation3], 2304  }
   0xa   :  { %1997 = vsyncadd [#allocation3], 4294964992 }
   0xb   :  { %1998 = dma.done.wait [#allocation6], 3968  }
   0xc   :  { %1999 = vsyncadd [#allocation6], 4294963328  ;;  %vm89_vm0 = vcmask 261120   ;;  %v85_v0 = vld [vmem:[%s2401_s0] sm:$0xff]  ;;  %v86_v1 = vld [vmem:[%s2401_s0 + $0x8] sm:$0xff]  ;;  %v2008_v4 = vmov 32.0  }
   0xd   :  { %v90_v2 = vsel %vm89_vm0, %v85_v0, 0.0  ;;  %v93_v3 = vsel %vm89_vm0, %v86_v1, 0.0  ;;  %1872 = vrcp.f32 %v2008_v4  ;;  %v1809_v21 = vld [vmem:[#allocation2 + $0x8] sm:$0xff]  ;;  %v1808_v25 = vld [vmem:[#allocation2] sm:$0xff]  ;;  %v1848_v46 = vld [vmem:[#allocation5] ss:$0 sm:$0xff] }
   0xe   :  { %91 = vadd.xlane.f32.xlu0 %v90_v2  ;;  %v1811_v22 = vld [vmem:[#allocation2 + $0x28] sm:$0xff]  ;;  %175 = vmatpush.bf16.msra.mxu0 %v1809_v21  ;;  %v1810_v26 = vld [vmem:[#allocation2 + $0x20] sm:$0xff]  ;;  %v1849_v51 = vld [vmem:[#allocation5 + $0x1] ss:$0 sm:$0xff]  ;;  %vm249_vm8 = vcmask 130048   ;;  %vm429_vm9 = vcmask 523264  }
   0xf   :  { %v1813_v23 = vld [vmem:[#allocation2 + $0x48] sm:$0xff]  ;;  %208 = vmatpush.bf16.msra.mxu1 %v1811_v22  ;;  %v1812_v28 = vld [vmem:[#allocation2 + $0x40] sm:$0xff]  ;;  %v1851_v57 = vld [vmem:[#allocation5 + $0x3] ss:$0 sm:$0xff]  ;;  %s1576_s14 = sshll.u32 %s2407_s6, 4  ;;  %s1577_s14 = int_to_ptr.hbm [resolvable:$true] %s1576_s14 }
  0x10   :  { %241 = vmatpush.bf16.msra.mxu2 %v1813_v23  ;;  %v2076_v62 = vld [vmem:[#allocation5 + $0x38] sm:$0xff]  ;;  %v1852_v63 = vld [vmem:[#allocation5 + $0x4] ss:$0 sm:$0xff]  ;;  %v2086_v4 = vld [vmem:[#allocation5 + $0x48] sm:$0xff] }
  0x11   :  { %v2127_v21 = vld [vmem:[#allocation5 + $0xa8] sm:$0xff]  ;;  %v2131_v23 = vld [vmem:[#allocation5 + $0xa0] sm:$0xff] }
  0x12   :  { %176 = vmatpush.bf16.msra.mxu0 %v1808_v25  ;;  %v2135_v25 = vld [vmem:[#allocation5 + $0x98] sm:$0xff] }
  0x13   :  { %v1873_v5 = vpop.eup %1872  ;;  %209 = vmatpush.bf16.msra.mxu1 %v1810_v26 }
  0x14   :  { %v97_v6 = vmul.f32 32.0, %v1873_v5  ;;  %vm101_vm1 = vweird.f32 %v1873_v5  ;;  %242 = vmatpush.bf16.msra.mxu2 %v1812_v28 }
  0x16   :  { %94 = vadd.xlane.f32.xlu0 %v93_v3  ;;  %v98_v7 = vsub.f32 1.0, %v97_v6  ;;  %v2080_v3 = vld [vmem:[#allocation5 + $0x40] sm:$0xff]  ;;  %v2098_v6 = vld [vmem:[#allocation5 + $0x58] sm:$0xff] }
  0x18   :  { %v99_v8 = vmul.f32 %v1873_v5, %v98_v7  ;;  %v2104_v7 = vld [vmem:[#allocation5 + $0x60] sm:$0xff] }
  0x1a   :  { %v100_v9 = vadd.f32 %v1873_v5, %v99_v8  ;;  %v2110_v8 = vld [vmem:[#allocation5 + $0x68] sm:$0xff] }
  0x1c   :  { %v2059_v10 = vsel %vm101_vm1, %v1873_v5, %v100_v9  ;;  %v2092_v5 = vld [vmem:[#allocation5 + $0x50] sm:$0xff] }
  0x1d   :  { %v2116_v9 = vld [vmem:[#allocation5 + $0x70] sm:$0xff] }
  0x81   :  { %v92_v11 = vpop.xlane.xlu0 %91 }
  0x82   :  { %v103_v12 = vmul.f32 %v2059_v10, %v92_v11 }
  0x84   :  { %v105_v13 = vsub.f32 %v85_v0, %v103_v12 }
  0x86   :  { %v107_v14 = vmul.f32 %v105_v13, %v105_v13 }
  0x88   :  { %v109_v15 = vsel %vm89_vm0, %v107_v14, 0.0 }
  0x89   :  { %110 = vadd.xlane.f32.xlu1 %v109_v15  ;;  %v95_v16 = vpop.xlane.xlu0 %94 }
  0x8a   :  { %v104_v17 = vmul.f32 %v2059_v10, %v95_v16 }
  0x8c   :  { %v106_v18 = vsub.f32 %v86_v1, %v104_v17 }
  0x8e   :  { %v108_v19 = vmul.f32 %v106_v18, %v106_v18 }
  0x90   :  { %v112_v20 = vsel %vm89_vm0, %v108_v19, 0.0 }
  0x91   :  { %113 = vadd.xlane.f32.xlu1 %v112_v20 }
  0xfc   :  { %v111_v24 = vpop.xlane.xlu1 %110 }
  0xfd   :  { %v115_v27 = vmul.f32 %v111_v24, %v2059_v10 }
  0xff   :  { %v117_v29 = vadd.f32 1e-12, %v115_v27  ;;  %v2139_v27 = vld [vmem:[#allocation5 + $0x90] sm:$0xff] }
 0x101   :  { %1874 = vrsqrt.f32 %v117_v29  ;;  %vm125_vm3 = vweird.f32 %v117_v29 }
 0x104   :  { %v114_v30 = vpop.xlane.xlu1 %113 }
 0x105   :  { %v116_v31 = vmul.f32 %v114_v30, %v2059_v10 }
 0x107   :  { %v1875_v32 = vpop.eup %1874  ;;  %v118_v33 = vadd.f32 1e-12, %v116_v31  ;;  %v2147_v31 = vld [vmem:[#allocation5 + $0x80] sm:$0xff] }
 0x108   :  { %v120_v34 = vmul.f32 %v1875_v32, %v117_v29  ;;  %vm126_vm2 = vweird.f32 %v1875_v32  ;;  %v2143_v29 = vld [vmem:[#allocation5 + $0x88] sm:$0xff] }
 0x109   :  { %1876 = vrsqrt.f32 %v118_v33  ;;  %vm127_vm4 = vmor %vm125_vm3, %vm126_vm2  ;;  %vm135_vm6 = vweird.f32 %v118_v33 }
 0x10a   :  { %v121_v35 = vmul.f32 %v1875_v32, %v120_v34 }
 0x10c   :  { %v122_v36 = vmul.f32 0.5, %v121_v35  ;;  %v1850_v35 = vld [vmem:[#allocation5 + $0x2] ss:$0 sm:$0xff] }
 0x10e   :  { %v123_v37 = vsub.f32 1.5, %v122_v36 }
 0x10f   :  { %v1877_v38 = vpop.eup %1876 }
 0x110   :  { %v124_v39 = vmul.f32 %v1875_v32, %v123_v37  ;;  %v130_v40 = vmul.f32 %v1877_v38, %v118_v33  ;;  %vm136_vm5 = vweird.f32 %v1877_v38  ;;  %v2151_v33 = vld [vmem:[#allocation5 + $0x78] sm:$0xff] }
 0x111   :  { %vm137_vm7 = vmor %vm135_vm6, %vm136_vm5 }
 0x112   :  { %v131_v41 = vmul.f32 %v1877_v38, %v130_v40  ;;  %v128_v42 = vsel %vm127_vm4, %v1875_v32, %v124_v39  ;;  %v2158_v40 = vld [vmem:[#allocation5 + $0xf0] sm:$0xff] }
 0x113   :  { %v139_v45 = vmul.f32 %v128_v42, %v105_v13  ;;  %456 = vmatpush.msrb.mxu2 %v2158_v40 }
 0x114   :  { %v132_v43 = vmul.f32 0.5, %v131_v41  ;;  %v2160_v41 = vld [vmem:[#allocation5 + $0xe8] sm:$0xff] }
 0x115   :  { %v142_v50 = vmul.f32 %v1848_v46, %v139_v45  ;;  %457 = vmatpush.msrb.mxu2 %v2160_v41 }
 0x116   :  { %v133_v44 = vsub.f32 1.5, %v132_v43  ;;  %v2164_v43 = vld [vmem:[#allocation5 + $0x28] sm:$0xff] }
 0x117   :  { %v2067_v53 = vadd.f32 %v1849_v51, %v142_v50 }
 0x118   :  { %v134_v47 = vmul.f32 %v1877_v38, %v133_v44 }
 0x11a   :  { %v138_v48 = vsel %vm137_vm7, %v1877_v38, %v134_v47 }
 0x11b   :  { %v140_v49 = vmul.f32 %v138_v48, %v106_v18  ;;  %v2124_v18 = vld [vmem:[#allocation5 + $0xb0] sm:$0xff] }
 0x11c   :  { %v2168_v48 = vld [vmem:[#allocation5 + $0x30] sm:$0xff] }
 0x11d   :  { %v143_v52 = vmul.f32 %v1848_v46, %v140_v49 }
 0x11f   :  { %v2069_v54 = vadd.f32 %v1849_v51, %v143_v52  ;;  %v2172_v52 = vld [vmem:[#allocation5 + $0xe0] sm:$0xff] }
 0x120   :  { %458 = vmatpush.msrb.mxu2 %v2172_v52 }
 0x121   :  { %v147_v55 = vpack.c.bf16 %v2069_v54, %v2067_v53 }
 0x123   :  { %1595 = vmatmul.msk.bf16.vlgmr.msra.gmra.mxu0 %vm89_vm0, %v147_v55  ;;  %1604 = vmatmul.msk.bf16.vlgmr.msra.gmra.mxu1 %vm89_vm0, %v147_v55 }
 0x124   :  { %1613 = vmatmul.msk.bf16.vlgmr.msra.gmra.mxu2 %vm89_vm0, %v147_v55  ;;  %v2175_v55 = vld [vmem:[#allocation5 + $0xd8] sm:$0xff] }
 0x125   :  { %459 = vmatpush.msrb.mxu2 %v2175_v55 }
 0x1a0   :  { %v211_v56 = vpop.f32.mrf.mxu1  ;;  %v178_v34 = vpop.f32.mrf.mxu0 }
 0x1a1   :  { %v212_v61 = vadd.f32 %v1851_v57, %v211_v56  ;;  %v179_v37 = vadd.f32 %v1850_v35, %v178_v34  ;;  %v2178_v56 = vld [vmem:[#allocation5 + $0xd0] sm:$0xff] }
 0x1a2   :  { %460 = vmatpush.msrb.mxu2 %v2178_v56 }
 0x1a7   :  { %v244_v58 = vpop.f32.mrf.mxu2 }
 0x1a8   :  { %v213_v59 = vpop.f32.mrf.mxu1  ;;  %v245_v2 = vadd.f32 %v1852_v63, %v244_v58  ;;  %v180_v38 = vpop.f32.mrf.mxu0  ;;  %v2184_v58 = vld [vmem:[#allocation5 + $0xc0] sm:$0xff] }
 0x1a9   :  { %v214_v60 = vadd.f32 %v1851_v57, %v213_v59  ;;  %v181_v39 = vadd.f32 %v1850_v35, %v180_v38  ;;  %v2180_v57 = vld [vmem:[#allocation5 + $0xc8] sm:$0xff]  ;;  %v2187_v59 = vld [vmem:[#allocation5 + $0xb8] sm:$0xff] }
 0x1aa   :  { %461 = vmatpush.msrb.mxu2 %v2180_v57 }
 0x1ab   :  { %288 = vmatpush.msra.mxu3 %v214_v60  ;;  %v1815_v60 = vld [vmem:[#allocation2 + $0x68] sm:$0xff] }
 0x1ac   :  { %462 = vmatpush.msrb.mxu2 %v2184_v58 }
 0x1ad   :  { %289 = vmatpush.msra.mxu3 %v212_v61  ;;  %v1814_v61 = vld [vmem:[#allocation2 + $0x60] sm:$0xff] }
 0x1ae   :  { %1614 = vmatmul.msk.f32.vlgmr.msra.gmra.mxu3 %vm249_vm8, %v2076_v62  ;;  %463 = vmatpush.msrb.mxu2 %v2187_v59 }
 0x1af   :  { %v246_v0 = vpop.f32.mrf.mxu2 }
 0x1b0   :  { %v247_v1 = vadd.f32 %v1852_v63, %v246_v0  ;;  %540 = vmatpush.bf16.msra.mxu2 %v1815_v60 }
 0x1b2   :  { %337 = vmatpush.msrb.mxu0 %v247_v1 }
 0x1b4   :  { %338 = vmatpush.msrb.mxu0 %v245_v2  ;;  %541 = vmatpush.bf16.msra.mxu2 %v1814_v61 }
 0x1b5   :  { %1622 = vmatmul.msk.f32.vlgmr.msrb.gmra.mxu0 %vm249_vm8, %v2076_v62 }
 0x1b6   :  { %1615 = vmatmul.msk.f32.gmra.mxu3 %vm249_vm8, %v2080_v3 }
 0x1bd   :  { %1623 = vmatmul.msk.f32.gmra.mxu0 %vm249_vm8, %v2080_v3 }
 0x1be   :  { %1616 = vmatmul.msk.f32.gmra.mxu3 %vm249_vm8, %v2086_v4 }
 0x1c5   :  { %1624 = vmatmul.msk.f32.gmra.mxu0 %vm249_vm8, %v2086_v4 }
 0x1c6   :  { %1617 = vmatmul.msk.f32.gmra.mxu3 %vm249_vm8, %v2092_v5 }
 0x1cd   :  { %1625 = vmatmul.msk.f32.gmra.mxu0 %vm249_vm8, %v2092_v5 }
 0x1ce   :  { %1618 = vmatmul.msk.f32.gmra.mxu3 %vm249_vm8, %v2098_v6 }
 0x1d5   :  { %1626 = vmatmul.msk.f32.gmra.mxu0 %vm249_vm8, %v2098_v6 }
 0x1d6   :  { %1619 = vmatmul.msk.f32.gmra.mxu3 %vm249_vm8, %v2104_v7 }
 0x1dd   :  { %1627 = vmatmul.msk.f32.gmra.mxu0 %vm249_vm8, %v2104_v7 }
 0x1de   :  { %1620 = vmatmul.msk.f32.gmra.mxu3 %vm249_vm8, %v2110_v8 }
 0x1e5   :  { %1628 = vmatmul.msk.f32.gmra.mxu0 %vm249_vm8, %v2110_v8 }
 0x1e6   :  { %1621 = vmatmul.msk.f32.gmra.mxu3 %vm249_vm8, %v2116_v9 }
 0x1ed   :  { %1629 = vmatmul.msk.f32.gmra.mxu0 %vm249_vm8, %v2116_v9 }
 0x231   :  { %v291_v11 = vpop.f32.mrf.mxu3 }
 0x232   :  { %v315_v36 = vmul.f32 %v291_v11, %v2151_v33  ;;  %v340_v63 = vpop.f32.mrf.mxu0 }
 0x239   :  { %v294_v12 = vpop.f32.mrf.mxu3 }
 0x23a   :  { %v316_v32 = vmul.f32 %v294_v12, %v2147_v31  ;;  %v343_v11 = vpop.f32.mrf.mxu0 }
 0x241   :  { %v297_v13 = vpop.f32.mrf.mxu3 }
 0x242   :  { %v317_v30 = vmul.f32 %v297_v13, %v2143_v29 }
 0x249   :  { %v300_v14 = vpop.f32.mrf.mxu3 }
 0x24a   :  { %v318_v28 = vmul.f32 %v300_v14, %v2139_v27 }
 0x251   :  { %v303_v15 = vpop.f32.mrf.mxu3 }
 0x252   :  { %v319_v26 = vmul.f32 %v303_v15, %v2135_v25 }
 0x259   :  { %v306_v16 = vpop.f32.mrf.mxu3 }
 0x25a   :  { %v320_v24 = vmul.f32 %v306_v16, %v2131_v23  ;;  %v346_v16 = vpop.f32.mrf.mxu0 }
 0x261   :  { %v309_v17 = vpop.f32.mrf.mxu3 }
 0x262   :  { %v321_v22 = vmul.f32 %v309_v17, %v2127_v21 }
 0x269   :  { %v312_v19 = vpop.f32.mrf.mxu3 }
 0x26a   :  { %v322_v20 = vmul.f32 %v312_v19, %v2124_v18  ;;  %v364_v19 = vmul.f32 %v340_v63, %v2151_v33 }
 0x26c   :  { %1630 = vmatpush.xpose.msk.msrb.mxu1 %vm89_vm0, %v322_v20  ;;  %v365_v20 = vmul.f32 %v343_v11, %v2147_v31 }
 0x270   :  { %1631 = vmatpush.xpose.msk.msrb.mxu1 %vm89_vm0, %v321_v22  ;;  %v501_v22 = vpack.c.bf16 %v365_v20, %v364_v19 }
 0x274   :  { %1632 = vmatpush.xpose.msk.msrb.mxu1 %vm89_vm0, %v320_v24  ;;  %v349_v24 = vpop.f32.mrf.mxu0 }
 0x278   :  { %1633 = vmatpush.xpose.msk.msrb.mxu1 %vm89_vm0, %v319_v26 }
 0x27c   :  { %1634 = vmatpush.xpose.msk.msrb.mxu1 %vm89_vm0, %v318_v28  ;;  %v352_v26 = vpop.f32.mrf.mxu0  ;;  %v366_v28 = vmul.f32 %v346_v16, %v2143_v29 }
 0x27d   :  { %v368_v35 = vmul.f32 %v352_v26, %v2135_v25 }
 0x280   :  { %1635 = vmatpush.xpose.msk.msrb.mxu1 %vm89_vm0, %v317_v30  ;;  %v367_v30 = vmul.f32 %v349_v24, %v2139_v27 }
 0x284   :  { %1636 = vmatpush.xpose.msk.msrb.mxu1 %vm89_vm0, %v316_v32  ;;  %v502_v32 = vpack.c.bf16 %v367_v30, %v366_v28  ;;  %v355_v34 = vpop.f32.mrf.mxu0 }
 0x288   :  { %1637 = vmatpush.xpose.msk.msrb.mxu1 %vm89_vm0, %v315_v36  ;;  %v369_v36 = vmul.f32 %v355_v34, %v2131_v23 }
 0x28a   :  { %v503_v38 = vpack.c.bf16 %v369_v36, %v368_v35 }
 0x28b   :  { %1638 = vmatmul.msk.f32.vlgmr.msrb.gmra.mxu1 %vm89_vm0, %v179_v37 }
 0x28c   :  { %v358_v37 = vpop.f32.mrf.mxu0 }
 0x293   :  { %1639 = vmatmul.msk.f32.gmra.mxu1 %vm89_vm0, %v181_v39 }
 0x294   :  { %v361_v39 = vpop.f32.mrf.mxu0 }
 0x308   :  { %v419_v42 = vpop.f32.mrf.mxu1 }
 0x309   :  { %v425_v44 = vmul.f32 0.35355338, %v419_v42  ;;  %v370_v42 = vmul.f32 %v358_v37, %v2127_v21 }
 0x30b   :  { %v427_v45 = vadd.f32 %v425_v44, %v2164_v43  ;;  %v371_v44 = vmul.f32 %v361_v39, %v2124_v18 }
 0x30d   :  { %v430_v46 = vsel %vm429_vm9, %v427_v45, -inf }
 0x30e   :  { %431 = vmax.xlane.f32.xlu2 %v430_v46 }
 0x310   :  { %v422_v47 = vpop.f32.mrf.mxu1 }
 0x311   :  { %v426_v49 = vmul.f32 0.35355338, %v422_v47 }
 0x313   :  { %v428_v50 = vadd.f32 %v426_v49, %v2168_v48 }
 0x315   :  { %v433_v51 = vsel %vm429_vm9, %v428_v50, -inf }
 0x316   :  { %434 = vmax.xlane.f32.xlu2 %v433_v51 }
 0x381   :  { %v432_v0 = vpop.xlane.xlu2 %431 }
 0x382   :  { %v436_v1 = vsub.f32 %v427_v45, %v432_v0  ;;  %v504_v45 = vpack.c.bf16 %v371_v44, %v370_v42 }
 0x384   :  { %v438_v2 = vmul.f32 1.442695, %v436_v1 }
 0x386   :  { %1878 = vpow2.f32 %v438_v2 }
 0x389   :  { %v435_v12 = vpop.xlane.xlu2 %434 }
 0x38a   :  { %v437_v13 = vsub.f32 %v428_v50, %v435_v12 }
 0x38c   :  { %v2190_v14 = vpop.eup %1878  ;;  %v440_v15 = vmul.f32 1.442695, %v437_v13 }
 0x38d   :  { %1640 = vmatmul.msk.f32.vlgmr.msrb.gmra.mxu2 %vm429_vm9, %v2190_v14 }
 0x38e   :  { %1880 = vpow2.f32 %v440_v15 }
 0x394   :  { %v2194_v17 = vpop.eup %1880 }
 0x395   :  { %1641 = vmatmul.msk.f32.gmra.mxu2 %vm429_vm9, %v2194_v17 }
 0x39d   :  { %1650 = vmatmul.msk.bf16.vlgmr.msra.gmra.mxu2 %vm89_vm0, %v501_v22 }
 0x3ad   :  { %1651 = vmatmul.msk.bf16.gmra.mxu2 %vm89_vm0, %v502_v32 }
 0x3bd   :  { %1652 = vmatmul.msk.bf16.gmra.mxu2 %vm89_vm0, %v503_v38 }
 0x3cd   :  { %1653 = vmatmul.msk.bf16.gmra.mxu2 %vm89_vm0, %v504_v45  ;;  %v1853_v45 = vld [vmem:[#allocation5 + $0x5] ss:$0 sm:$0xff] }
 0x410   :  { %v465_v46 = vpop.f32.mrf.mxu2 }
 0x411   :  { %1882 = vrcp.f32 %v465_v46  ;;  %v482_v22 = vand.u32 2147483648, %v465_v46  ;;  %vm476_vm11 = vweird.f32 %v465_v46  ;;  %v480_v24 = vand.u32 2147483647, %v465_v46 }
 0x413   :  { %v483_v30 = vor.u32 1.1754944e-38, %v482_v22  ;;  %vm481_vm13 = vcmp.eq.f32.partialorder %v480_v24, 8.507059e+37 }
 0x417   :  { %v1883_v0 = vpop.eup %1882 }
 0x418   :  { %v468_v47 = vpop.f32.mrf.mxu2  ;;  %v472_v1 = vmul.f32 %v1883_v0, %v465_v46  ;;  %vm477_vm10 = vweird.f32 %v1883_v0 }
 0x419   :  { %1884 = vrcp.f32 %v468_v47  ;;  %vm478_vm12 = vmor %vm476_vm11, %vm477_vm10  ;;  %v497_v35 = vand.u32 2147483648, %v468_v47  ;;  %vm491_vm15 = vweird.f32 %v468_v47  ;;  %v495_v37 = vand.u32 2147483647, %v468_v47 }
 0x41a   :  { %v473_v11 = vsub.f32 1.0, %v472_v1 }
 0x41b   :  { %v498_v39 = vor.u32 1.1754944e-38, %v497_v35  ;;  %vm496_vm2 = vcmp.eq.f32.partialorder %v495_v37, 8.507059e+37 }
 0x41c   :  { %v474_v13 = vmul.f32 %v1883_v0, %v473_v11 }
 0x41e   :  { %v475_v19 = vadd.f32 %v1883_v0, %v474_v13 }
 0x41f   :  { %v1885_v12 = vpop.eup %1884 }
 0x420   :  { %v543_v49 = vpop.f32.mrf.mxu2  ;;  %v487_v15 = vmul.f32 %v1885_v12, %v468_v47  ;;  %v479_v26 = vsel %vm478_vm12, %v1883_v0, %v475_v19  ;;  %vm492_vm14 = vweird.f32 %v1885_v12 }
 0x421   :  { %v484_v32 = vsel %vm481_vm13, %v483_v30, %v479_v26  ;;  %vm493_vm1 = vmor %vm491_vm15, %vm492_vm14 }
 0x422   :  { %v488_v20 = vsub.f32 1.0, %v487_v15  ;;  %v485_v36 = vmul.f32 %v2190_v14, %v484_v32 }
 0x424   :  { %v489_v28 = vmul.f32 %v1885_v12, %v488_v20  ;;  %v1816_v20 = vld [vmem:[%s2403_s2] sm:$0xff] }
 0x426   :  { %v490_v34 = vadd.f32 %v1885_v12, %v489_v28 }
 0x428   :  { %v545_v50 = vpop.f32.mrf.mxu2  ;;  %v494_v38 = vsel %vm493_vm1, %v1885_v12, %v490_v34 }
 0x429   :  { %v499_v42 = vsel %vm496_vm2, %v498_v39, %v494_v38 }
 0x42a   :  { %v500_v44 = vmul.f32 %v2194_v17, %v499_v42 }
 0x430   :  { %v548_v51 = vpop.f32.mrf.mxu2 }
 0x438   :  { %v550_v60 = vpop.f32.mrf.mxu2 }
 0x440   :  { %v553_v61 = vpop.f32.mrf.mxu2 }
 0x448   :  { %v555_v63 = vpop.f32.mrf.mxu2 }
 0x450   :  { %v558_v2 = vpop.f32.mrf.mxu2 }
 0x458   :  { %v560_v16 = vpop.f32.mrf.mxu2 }
 0x459   :  { %579 = vmatpush.msra.mxu1 %v560_v16 }
 0x45b   :  { %580 = vmatpush.msra.mxu1 %v558_v2 }
 0x45d   :  { %581 = vmatpush.msra.mxu1 %v555_v63 }
 0x45f   :  { %582 = vmatpush.msra.mxu1 %v553_v61 }
 0x461   :  { %583 = vmatpush.msra.mxu1 %v550_v60 }
 0x463   :  { %584 = vmatpush.msra.mxu1 %v548_v51 }
 0x465   :  { %585 = vmatpush.msra.mxu1 %v545_v50 }
 0x467   :  { %586 = vmatpush.msra.mxu1 %v543_v49 }
 0x468   :  { %1654 = vmatmul.msk.f32.vlgmr.msra.gmra.mxu1 %vm429_vm9, %v485_v36 }
 0x470   :  { %1655 = vmatmul.msk.f32.gmra.mxu1 %vm429_vm9, %v500_v44 }
 0x4e5   :  { %v588_v46 = vpop.f32.mrf.mxu1 }
 0x4e6   :  { %v589_v51 = vadd.f32 %v1853_v45, %v588_v46 }
 0x4e8   :  { %v594_v50 = vadd.f32 %v589_v51, %v2067_v53 }
 0x4ea   :  { %v598_v14 = vsel %vm89_vm0, %v594_v50, 0.0 }
 0x4eb   :  { %599 = vadd.xlane.f32.xlu0 %v598_v14 }
 0x4ed   :  { %v591_v47 = vpop.f32.mrf.mxu1 }
 0x4ee   :  { %v592_v49 = vadd.f32 %v1853_v45, %v591_v47 }
 0x4f0   :  { %v595_v60 = vadd.f32 %v592_v49, %v2069_v54  ;;  %v1817_v54 = vld [vmem:[%s2403_s2 + $0x8] sm:$0xff] }
 0x4f1   :  { %676 = vmatpush.bf16.msrb.mxu3 %v1817_v54 }
 0x4f2   :  { %v601_v61 = vsel %vm89_vm0, %v595_v60, 0.0 }
 0x4f3   :  { %602 = vadd.xlane.f32.xlu1 %v601_v61  ;;  %v1855_v61 = vld [vmem:[#allocation5 + $0x7] ss:$0 sm:$0xff] }
 0x4f5   :  { %677 = vmatpush.bf16.msrb.mxu3 %v1816_v20 }
 0x55e   :  { %v600_v63 = vpop.xlane.xlu0 %599 }
 0x55f   :  { %v604_v17 = vmul.f32 %v600_v63, %v2059_v10 }
 0x561   :  { %v606_v0 = vsub.f32 %v594_v50, %v604_v17  ;;  %v1854_v50 = vld [vmem:[#allocation5 + $0x6] ss:$0 sm:$0xff] }
 0x563   :  { %v608_v1 = vmul.f32 %v606_v0, %v606_v0 }
 0x565   :  { %v610_v2 = vsel %vm89_vm0, %v608_v1, 0.0 }
 0x566   :  { %611 = vadd.xlane.f32.xlu2 %v610_v2  ;;  %v603_v11 = vpop.xlane.xlu1 %602 }
 0x567   :  { %v605_v53 = vmul.f32 %v603_v11, %v2059_v10  ;;  %v1821_v11 = vld [vmem:[%s2404_s3 + $0x18] sm:$0xff] }
 0x568   :  { %744 = vmatpush.bf16.msrb.mxu1 %v1821_v11 }
 0x569   :  { %v607_v12 = vsub.f32 %v595_v60, %v605_v53  ;;  %v1819_v53 = vld [vmem:[%s2404_s3 + $0x8] sm:$0xff] }
 0x56b   :  { %v609_v13 = vmul.f32 %v607_v12, %v607_v12 }
 0x56d   :  { %v613_v15 = vsel %vm89_vm0, %v609_v13, 0.0  ;;  %v1856_v13 = vld [vmem:[#allocation5 + $0x8] ss:$0 sm:$0xff] }
 0x56e   :  { %614 = vadd.xlane.f32.xlu0 %v613_v15 }
 0x5d9   :  { %v612_v16 = vpop.xlane.xlu2 %611 }
 0x5da   :  { %v616_v19 = vmul.f32 %v612_v16, %v2059_v10 }
 0x5dc   :  { %v618_v22 = vadd.f32 1e-12, %v616_v19 }
 0x5de   :  { %1886 = vrsqrt.f32 %v618_v22  ;;  %vm626_vm4 = vweird.f32 %v618_v22 }
 0x5e1   :  { %v615_v24 = vpop.xlane.xlu0 %614 }
 0x5e2   :  { %v617_v26 = vmul.f32 %v615_v24, %v2059_v10 }
 0x5e4   :  { %v1887_v28 = vpop.eup %1886  ;;  %v619_v30 = vadd.f32 1e-12, %v617_v26 }
 0x5e5   :  { %v621_v32 = vmul.f32 %v1887_v28, %v618_v22  ;;  %vm627_vm3 = vweird.f32 %v1887_v28 }
 0x5e6   :  { %1888 = vrsqrt.f32 %v619_v30  ;;  %vm628_vm5 = vmor %vm626_vm4, %vm627_vm3  ;;  %vm636_vm7 = vweird.f32 %v619_v30 }
 0x5e7   :  { %v622_v34 = vmul.f32 %v1887_v28, %v621_v32 }
 0x5e9   :  { %v623_v35 = vmul.f32 0.5, %v622_v34 }
 0x5eb   :  { %v624_v36 = vsub.f32 1.5, %v623_v35 }
 0x5ec   :  { %v1889_v37 = vpop.eup %1888 }
 0x5ed   :  { %v625_v38 = vmul.f32 %v1887_v28, %v624_v36  ;;  %v631_v39 = vmul.f32 %v1889_v37, %v619_v30  ;;  %vm637_vm6 = vweird.f32 %v1889_v37 }
 0x5ee   :  { %vm638_vm10 = vmor %vm636_vm7, %vm637_vm6 }
 0x5ef   :  { %v632_v42 = vmul.f32 %v1889_v37, %v631_v39  ;;  %v629_v44 = vsel %vm628_vm5, %v1887_v28, %v625_v38 }
 0x5f0   :  { %v640_v51 = vmul.f32 %v629_v44, %v606_v0  ;;  %v1820_v0 = vld [vmem:[%s2404_s3 + $0x10] sm:$0xff] }
 0x5f1   :  { %v633_v45 = vmul.f32 0.5, %v632_v42  ;;  %745 = vmatpush.bf16.msrb.mxu1 %v1820_v0 }
 0x5f2   :  { %v643_v60 = vmul.f32 %v1854_v50, %v640_v51 }
 0x5f3   :  { %v634_v46 = vsub.f32 1.5, %v633_v45 }
 0x5f4   :  { %v646_v17 = vadd.f32 %v1855_v61, %v643_v60 }
 0x5f5   :  { %v635_v14 = vmul.f32 %v1889_v37, %v634_v46  ;;  %746 = vmatpush.bf16.msrb.mxu1 %v1819_v53 }
 0x5f7   :  { %v639_v47 = vsel %vm638_vm10, %v1889_v37, %v635_v14  ;;  %v1857_v14 = vld [vmem:[#allocation5 + $0x9] ss:$0 sm:$0xff] }
 0x5f8   :  { %v641_v49 = vmul.f32 %v639_v47, %v607_v12  ;;  %v1818_v12 = vld [vmem:[%s2404_s3] sm:$0xff] }
 0x5f9   :  { %747 = vmatpush.bf16.msrb.mxu1 %v1818_v12 }
 0x5fa   :  { %v644_v63 = vmul.f32 %v1854_v50, %v641_v49 }
 0x5fc   :  { %v647_v1 = vadd.f32 %v1855_v61, %v644_v63 }
 0x5fe   :  { %v648_v2 = vpack.c.bf16 %v647_v1, %v646_v17 }
 0x600   :  { %1664 = vmatmul.msk.bf16.vlgmr.msrb.gmra.mxu3 %vm89_vm0, %v648_v2 }
 0x683   :  { %v679_v15 = vpop.f32.mrf.mxu3 }
 0x684   :  { %v680_v54 = vadd.f32 %v1856_v13, %v679_v15 }
 0x686   :  { %v686_v16 = vmul.f32 0.044715, %v680_v54  ;;  %v684_v42 = vmul.f32 0.5, %v680_v54 }
 0x688   :  { %v688_v19 = vmul.f32 %v686_v16, %v680_v54 }
 0x68a   :  { %v690_v20 = vmul.f32 %v688_v19, %v680_v54 }
 0x68b   :  { %v681_v22 = vpop.f32.mrf.mxu3 }
 0x68c   :  { %v692_v24 = vadd.f32 %v690_v20, %v680_v54  ;;  %v682_v26 = vadd.f32 %v1856_v13, %v681_v22 }
 0x68e   :  { %v687_v28 = vmul.f32 0.044715, %v682_v26  ;;  %v694_v30 = vmul.f32 0.7978846, %v692_v24  ;;  %v685_v44 = vmul.f32 0.5, %v682_v26  ;;  %v1825_v24 = vld [vmem:[#allocation2 + $0x38] sm:$0xff] }
 0x68f   :  { %870 = vmatpush.bf16.msra.mxu0 %v1825_v24 }
 0x690   :  { %v689_v32 = vmul.f32 %v687_v28, %v682_v26  ;;  %1890 = vtanh.f32 %v694_v30 }
 0x692   :  { %v691_v34 = vmul.f32 %v689_v32, %v682_v26 }
 0x694   :  { %v693_v35 = vadd.f32 %v691_v34, %v682_v26  ;;  %v1827_v26 = vld [vmem:[#allocation2 + $0x58] sm:$0xff]  ;;  %v1822_v34 = vld [vmem:[#allocation2 + $0x10] sm:$0xff] }
 0x695   :  { %903 = vmatpush.bf16.msra.mxu1 %v1827_v26 }
 0x696   :  { %v695_v36 = vmul.f32 0.7978846, %v693_v35  ;;  %v1891_v37 = vpop.eup %1890  ;;  %v1824_v35 = vld [vmem:[#allocation2 + $0x30] sm:$0xff] }
 0x697   :  { %v698_v38 = vadd.f32 1.0, %v1891_v37  ;;  %871 = vmatpush.bf16.msra.mxu0 %v1824_v35 }
 0x698   :  { %1892 = vtanh.f32 %v695_v36  ;;  %v1826_v36 = vld [vmem:[#allocation2 + $0x50] sm:$0xff] }
 0x699   :  { %v700_v46 = vmul.f32 %v698_v38, %v684_v42  ;;  %904 = vmatpush.bf16.msra.mxu1 %v1826_v36 }
 0x69e   :  { %v1893_v39 = vpop.eup %1892 }
 0x69f   :  { %v699_v45 = vadd.f32 1.0, %v1893_v39 }
 0x6a1   :  { %v701_v51 = vmul.f32 %v699_v45, %v685_v44 }
 0x6a3   :  { %v702_v50 = vpack.c.bf16 %v701_v51, %v700_v46 }
 0x6a5   :  { %1681 = vmatmul.msk.bf16.vlgmr.msrb.gmra.mxu1 %vm429_vm9, %v702_v50 }
 0x6a6   :  { %1092 = vmatpush.msrb.mxu1 %v2158_v40 }
 0x6a8   :  { %1093 = vmatpush.msrb.mxu1 %v2160_v41 }
 0x6aa   :  { %1094 = vmatpush.msrb.mxu1 %v2172_v52 }
 0x6ac   :  { %1095 = vmatpush.msrb.mxu1 %v2175_v55 }
 0x6ae   :  { %1096 = vmatpush.msrb.mxu1 %v2178_v56  ;;  %v1858_v56 = vld [vmem:[#allocation5 + $0xa] ss:$0 sm:$0xff] }
 0x6b0   :  { %1097 = vmatpush.msrb.mxu1 %v2180_v57 }
 0x6b2   :  { %1098 = vmatpush.msrb.mxu1 %v2184_v58 }
 0x6b4   :  { %1099 = vmatpush.msrb.mxu1 %v2187_v59 }
 0x722   :  { %v749_v47 = vpop.f32.mrf.mxu1 }
 0x723   :  { %v750_v49 = vadd.f32 %v1857_v14, %v749_v47 }
 0x725   :  { %v754_v60 = vadd.f32 %v750_v49, %v646_v17 }
 0x727   :  { %v758_v61 = vsel %vm89_vm0, %v754_v60, 0.0 }
 0x728   :  { %759 = vadd.xlane.f32.xlu1 %v758_v61  ;;  %v1859_v61 = vld [vmem:[#allocation5 + $0xb] ss:$0 sm:$0xff] }
 0x72a   :  { %v751_v63 = vpop.f32.mrf.mxu1 }
 0x72b   :  { %v752_v2 = vadd.f32 %v1857_v14, %v751_v63 }
 0x72d   :  { %v755_v11 = vadd.f32 %v752_v2, %v647_v1  ;;  %v1823_v1 = vld [vmem:[#allocation2 + $0x18] sm:$0xff] }
 0x72e   :  { %837 = vmatpush.bf16.msra.mxu3 %v1823_v1 }
 0x72f   :  { %v761_v0 = vsel %vm89_vm0, %v755_v11, 0.0 }
 0x730   :  { %762 = vadd.xlane.f32.xlu2 %v761_v0 }
 0x732   :  { %838 = vmatpush.bf16.msra.mxu3 %v1822_v34 }
 0x79b   :  { %v760_v53 = vpop.xlane.xlu1 %759 }
 0x79c   :  { %v764_v12 = vmul.f32 %v760_v53, %v2059_v10 }
 0x79e   :  { %v766_v13 = vsub.f32 %v754_v60, %v764_v12 }
 0x7a0   :  { %v768_v15 = vmul.f32 %v766_v13, %v766_v13 }
 0x7a2   :  { %v770_v54 = vsel %vm89_vm0, %v768_v15, 0.0  ;;  %v1861_v15 = vld [vmem:[#allocation5 + $0xe] ss:$0 sm:$0xff] }
 0x7a3   :  { %v763_v16 = vpop.xlane.xlu2 %762  ;;  %771 = vadd.xlane.f32.xlu0 %v770_v54 }
 0x7a4   :  { %v765_v17 = vmul.f32 %v763_v16, %v2059_v10 }
 0x7a6   :  { %v767_v19 = vsub.f32 %v755_v11, %v765_v17 }
 0x7a8   :  { %v769_v20 = vmul.f32 %v767_v19, %v767_v19 }
 0x7aa   :  { %v773_v22 = vsel %vm89_vm0, %v769_v20, 0.0 }
 0x7ab   :  { %774 = vadd.xlane.f32.xlu1 %v773_v22 }
 0x816   :  { %v772_v28 = vpop.xlane.xlu0 %771 }
 0x817   :  { %v776_v30 = vmul.f32 %v772_v28, %v2059_v10 }
 0x819   :  { %v778_v32 = vadd.f32 1e-12, %v776_v30 }
 0x81b   :  { %1894 = vrsqrt.f32 %v778_v32  ;;  %vm786_vm12 = vweird.f32 %v778_v32 }
 0x81e   :  { %v775_v37 = vpop.xlane.xlu1 %774 }
 0x81f   :  { %v777_v38 = vmul.f32 %v775_v37, %v2059_v10  ;;  %v1862_v37 = vld [vmem:[#allocation5 + $0xc] ss:$0 sm:$0xff] }
 0x821   :  { %v1895_v39 = vpop.eup %1894  ;;  %v779_v42 = vadd.f32 1e-12, %v777_v38 }
 0x822   :  { %v781_v44 = vmul.f32 %v1895_v39, %v778_v32  ;;  %vm787_vm11 = vweird.f32 %v1895_v39 }
 0x823   :  { %1896 = vrsqrt.f32 %v779_v42  ;;  %vm788_vm13 = vmor %vm786_vm12, %vm787_vm11  ;;  %vm796_vm15 = vweird.f32 %v779_v42 }
 0x824   :  { %v782_v45 = vmul.f32 %v1895_v39, %v781_v44 }
 0x826   :  { %v783_v46 = vmul.f32 0.5, %v782_v45 }
 0x828   :  { %v784_v40 = vsub.f32 1.5, %v783_v46 }
 0x829   :  { %v1897_v51 = vpop.eup %1896 }
 0x82a   :  { %v785_v50 = vmul.f32 %v1895_v39, %v784_v40  ;;  %v791_v41 = vmul.f32 %v1897_v51, %v779_v42  ;;  %vm797_vm14 = vweird.f32 %v1897_v51 }
 0x82b   :  { %vm798_vm1 = vmor %vm796_vm15, %vm797_vm14 }
 0x82c   :  { %v792_v52 = vmul.f32 %v1897_v51, %v791_v41  ;;  %v789_v14 = vsel %vm788_vm13, %v1895_v39, %v785_v50 }
 0x82d   :  { %v800_v49 = vmul.f32 %v789_v14, %v766_v13  ;;  %v1860_v13 = vld [vmem:[#allocation5 + $0xd] ss:$0 sm:$0xff] }
 0x82e   :  { %v793_v55 = vmul.f32 0.5, %v792_v52  ;;  %v1829_v14 = vld [vmem:[#allocation2 + $0x78] sm:$0xff] }
 0x82f   :  { %v803_v58 = vmul.f32 %v1858_v56, %v800_v49 }
 0x830   :  { %v794_v47 = vsub.f32 1.5, %v793_v55  ;;  %v1828_v55 = vld [vmem:[#allocation2 + $0x70] sm:$0xff] }
 0x831   :  { %v2260_v11 = vadd.f32 %v1859_v61, %v803_v58 }
 0x832   :  { %v795_v60 = vmul.f32 %v1897_v51, %v794_v47 }
 0x834   :  { %v799_v57 = vsel %vm798_vm1, %v1897_v51, %v795_v60 }
 0x835   :  { %v801_v63 = vmul.f32 %v799_v57, %v767_v19 }
 0x837   :  { %v804_v2 = vmul.f32 %v1858_v56, %v801_v63 }
 0x839   :  { %v2262_v59 = vadd.f32 %v1859_v61, %v804_v2 }
 0x83b   :  { %v808_v0 = vpack.c.bf16 %v2262_v59, %v2260_v11 }
 0x83d   :  { %1690 = vmatmul.msk.bf16.vlgmr.msra.gmra.mxu3 %vm89_vm0, %v808_v0  ;;  %1699 = vmatmul.msk.bf16.vlgmr.msra.gmra.mxu0 %vm89_vm0, %v808_v0 }
 0x83e   :  { %1708 = vmatmul.msk.bf16.vlgmr.msra.gmra.mxu1 %vm89_vm0, %v808_v0 }
 0x83f   :  { %1176 = vmatpush.bf16.msra.mxu1 %v1829_v14 }
 0x843   :  { %1177 = vmatpush.bf16.msra.mxu1 %v1828_v55  ;;  %v1863_v55 = vld [vmem:[#allocation5 + $0xf] ss:$0 sm:$0xff] }
 0x8ba   :  { %v873_v53 = vpop.f32.mrf.mxu0 }
 0x8bb   :  { %v906_v12 = vpop.f32.mrf.mxu1  ;;  %v874_v20 = vadd.f32 %v1860_v13, %v873_v53 }
 0x8bc   :  { %v907_v22 = vadd.f32 %v1861_v15, %v906_v12 }
 0x8c2   :  { %v875_v54 = vpop.f32.mrf.mxu0 }
 0x8c3   :  { %v876_v16 = vadd.f32 %v1860_v13, %v875_v54  ;;  %v908_v17 = vpop.f32.mrf.mxu1 }
 0x8c4   :  { %v909_v19 = vadd.f32 %v1861_v15, %v908_v17 }
 0x8c5   :  { %925 = vmatpush.msrb.mxu3 %v876_v16 }
 0x8c6   :  { %974 = vmatpush.msrb.mxu0 %v909_v19 }
 0x8c7   :  { %926 = vmatpush.msrb.mxu3 %v874_v20 }
 0x8c8   :  { %975 = vmatpush.msrb.mxu0 %v907_v22  ;;  %1709 = vmatmul.msk.f32.vlgmr.msrb.gmra.mxu3 %vm249_vm8, %v2076_v62 }
 0x8c9   :  { %1717 = vmatmul.msk.f32.vlgmr.msrb.gmra.mxu0 %vm249_vm8, %v2076_v62  ;;  %v840_v62 = vpop.f32.mrf.mxu3 }
 0x8ca   :  { %v841_v39 = vadd.f32 %v1862_v37, %v840_v62 }
 0x8d0   :  { %1710 = vmatmul.msk.f32.gmra.mxu3 %vm249_vm8, %v2080_v3 }
 0x8d1   :  { %1718 = vmatmul.msk.f32.gmra.mxu0 %vm249_vm8, %v2080_v3  ;;  %v842_v3 = vpop.f32.mrf.mxu3 }
 0x8d2   :  { %v843_v42 = vadd.f32 %v1862_v37, %v842_v3 }
 0x8d8   :  { %1711 = vmatmul.msk.f32.gmra.mxu3 %vm249_vm8, %v2086_v4 }
 0x8d9   :  { %1719 = vmatmul.msk.f32.gmra.mxu0 %vm249_vm8, %v2086_v4 }
 0x8e0   :  { %1712 = vmatmul.msk.f32.gmra.mxu3 %vm249_vm8, %v2092_v5 }
 0x8e1   :  { %1720 = vmatmul.msk.f32.gmra.mxu0 %vm249_vm8, %v2092_v5 }
 0x8e8   :  { %1713 = vmatmul.msk.f32.gmra.mxu3 %vm249_vm8, %v2098_v6 }
 0x8e9   :  { %1721 = vmatmul.msk.f32.gmra.mxu0 %vm249_vm8, %v2098_v6 }
 0x8f0   :  { %1714 = vmatmul.msk.f32.gmra.mxu3 %vm249_vm8, %v2104_v7 }
 0x8f1   :  { %1722 = vmatmul.msk.f32.gmra.mxu0 %vm249_vm8, %v2104_v7 }
 0x8f8   :  { %1715 = vmatmul.msk.f32.gmra.mxu3 %vm249_vm8, %v2110_v8 }
 0x8f9   :  { %1723 = vmatmul.msk.f32.gmra.mxu0 %vm249_vm8, %v2110_v8 }
 0x900   :  { %1716 = vmatmul.msk.f32.gmra.mxu3 %vm249_vm8, %v2116_v9 }
 0x901   :  { %1724 = vmatmul.msk.f32.gmra.mxu0 %vm249_vm8, %v2116_v9 }
 0x946   :  { %v977_v47 = vpop.f32.mrf.mxu0 }
 0x947   :  { %v1001_v0 = vmul.f32 %v977_v47, %v2151_v33 }
 0x94b   :  { %v928_v4 = vpop.f32.mrf.mxu3 }
 0x94c   :  { %v952_v38 = vmul.f32 %v928_v4, %v2151_v33 }
 0x953   :  { %v931_v5 = vpop.f32.mrf.mxu3 }
 0x954   :  { %v953_v36 = vmul.f32 %v931_v5, %v2147_v31 }
 0x95b   :  { %v934_v6 = vpop.f32.mrf.mxu3 }
 0x95c   :  { %v954_v35 = vmul.f32 %v934_v6, %v2143_v29 }
 0x963   :  { %v937_v1 = vpop.f32.mrf.mxu3 }
 0x964   :  { %v955_v34 = vmul.f32 %v937_v1, %v2139_v27 }
 0x96b   :  { %v940_v24 = vpop.f32.mrf.mxu3 }
 0x96c   :  { %v956_v32 = vmul.f32 %v940_v24, %v2135_v25 }
 0x973   :  { %v943_v7 = vpop.f32.mrf.mxu3 }
 0x974   :  { %v957_v9 = vmul.f32 %v943_v7, %v2131_v23 }
 0x97b   :  { %v946_v26 = vpop.f32.mrf.mxu3 }
 0x97c   :  { %v958_v8 = vmul.f32 %v946_v26, %v2127_v21 }
 0x983   :  { %v949_v28 = vpop.f32.mrf.mxu3 }
 0x984   :  { %v959_v30 = vmul.f32 %v949_v28, %v2124_v18 }
 0x986   :  { %1725 = vmatpush.xpose.msk.msrb.mxu2 %vm89_vm0, %v959_v30 }
 0x98a   :  { %1726 = vmatpush.xpose.msk.msrb.mxu2 %vm89_vm0, %v958_v8 }
 0x98e   :  { %1727 = vmatpush.xpose.msk.msrb.mxu2 %vm89_vm0, %v957_v9 }
 0x992   :  { %1728 = vmatpush.xpose.msk.msrb.mxu2 %vm89_vm0, %v956_v32 }
 0x996   :  { %1729 = vmatpush.xpose.msk.msrb.mxu2 %vm89_vm0, %v955_v34 }
 0x99a   :  { %1730 = vmatpush.xpose.msk.msrb.mxu2 %vm89_vm0, %v954_v35 }
 0x99e   :  { %1731 = vmatpush.xpose.msk.msrb.mxu2 %vm89_vm0, %v953_v36 }
 0x9a2   :  { %1732 = vmatpush.xpose.msk.msrb.mxu2 %vm89_vm0, %v952_v38 }
 0x9a5   :  { %1733 = vmatmul.msk.f32.vlgmr.msrb.gmra.mxu2 %vm89_vm0, %v841_v39 }
 0x9ad   :  { %1734 = vmatmul.msk.f32.gmra.mxu2 %vm89_vm0, %v843_v42 }
 0xa28   :  { %v1056_v44 = vpop.f32.mrf.mxu2 }
 0xa29   :  { %v1062_v45 = vmul.f32 0.35355338, %v1056_v44 }
 0xa2b   :  { %v1064_v46 = vadd.f32 %v1062_v45, %v2164_v43  ;;  %v980_v43 = vpop.f32.mrf.mxu0 }
 0xa2c   :  { %v1002_v53 = vmul.f32 %v980_v43, %v2147_v31 }
 0xa2d   :  { %v1066_v40 = vsel %vm429_vm9, %v1064_v46, -inf }
 0xa2e   :  { %1067 = vmax.xlane.f32.xlu2 %v1066_v40  ;;  %v1137_v12 = vpack.c.bf16 %v1002_v53, %v1001_v0 }
 0xa30   :  { %v1059_v51 = vpop.f32.mrf.mxu2 }
 0xa31   :  { %v1063_v50 = vmul.f32 0.35355338, %v1059_v51 }
 0xa33   :  { %v1065_v41 = vadd.f32 %v1063_v50, %v2168_v48  ;;  %v983_v48 = vpop.f32.mrf.mxu0 }
 0xa34   :  { %v1003_v54 = vmul.f32 %v983_v48, %v2143_v29 }
 0xa35   :  { %v1069_v52 = vsel %vm429_vm9, %v1065_v41, -inf }
 0xa36   :  { %1070 = vmax.xlane.f32.xlu0 %v1069_v52 }
 0xa3b   :  { %v986_v13 = vpop.f32.mrf.mxu0 }
 0xa3c   :  { %v1004_v16 = vmul.f32 %v986_v13, %v2139_v27 }
 0xa3e   :  { %v1138_v17 = vpack.c.bf16 %v1004_v16, %v1003_v54 }
 0xa43   :  { %v989_v15 = vpop.f32.mrf.mxu0 }
 0xa44   :  { %v1005_v20 = vmul.f32 %v989_v15, %v2135_v25 }
 0xa4b   :  { %v992_v19 = vpop.f32.mrf.mxu0 }
 0xa4c   :  { %v1006_v22 = vmul.f32 %v992_v19, %v2131_v23 }
 0xa4e   :  { %v1139_v62 = vpack.c.bf16 %v1006_v22, %v1005_v20  ;;  %v1830_v20 = vld [vmem:[%s2403_s2 + $0x10] sm:$0xff] }
 0xa53   :  { %v995_v33 = vpop.f32.mrf.mxu0 }
 0xa54   :  { %v1007_v3 = vmul.f32 %v995_v33, %v2127_v21 }
 0xa5b   :  { %v998_v31 = vpop.f32.mrf.mxu0 }
 0xa5c   :  { %v1008_v4 = vmul.f32 %v998_v31, %v2124_v18 }
 0xa5e   :  { %v1140_v29 = vpack.c.bf16 %v1008_v4, %v1007_v3 }
 0xaa1   :  { %v1068_v56 = vpop.xlane.xlu2 %1067 }
 0xaa2   :  { %v1072_v49 = vsub.f32 %v1064_v46, %v1068_v56 }
 0xaa4   :  { %v1074_v60 = vmul.f32 1.442695, %v1072_v49 }
 0xaa6   :  { %1898 = vpow2.f32 %v1074_v60 }
 0xaa9   :  { %v1071_v57 = vpop.xlane.xlu0 %1070 }
 0xaaa   :  { %v1073_v61 = vsub.f32 %v1065_v41, %v1071_v57 }
 0xaac   :  { %v2323_v58 = vpop.eup %1898  ;;  %v1076_v63 = vmul.f32 1.442695, %v1073_v61 }
 0xaad   :  { %1735 = vmatmul.msk.f32.vlgmr.msrb.gmra.mxu1 %vm429_vm9, %v2323_v58 }
 0xaae   :  { %1900 = vpow2.f32 %v1076_v63 }
 0xab4   :  { %v2327_v2 = vpop.eup %1900 }
 0xab5   :  { %1736 = vmatmul.msk.f32.gmra.mxu1 %vm429_vm9, %v2327_v2 }
 0xabd   :  { %1745 = vmatmul.msk.bf16.vlgmr.msra.gmra.mxu1 %vm89_vm0, %v1137_v12 }
 0xacd   :  { %1746 = vmatmul.msk.bf16.gmra.mxu1 %vm89_vm0, %v1138_v17 }
 0xadd   :  { %1747 = vmatmul.msk.bf16.gmra.mxu1 %vm89_vm0, %v1139_v62 }
 0xaed   :  { %1748 = vmatmul.msk.bf16.gmra.mxu1 %vm89_vm0, %v1140_v29 }
 0xb2a   :  { %v1101_v27 = vpop.f32.mrf.mxu1 }
 0xb2b   :  { %1902 = vrcp.f32 %v1101_v27  ;;  %v1118_v36 = vand.u32 2147483648, %v1101_v27  ;;  %vm1112_vm3 = vweird.f32 %v1101_v27  ;;  %v1116_v37 = vand.u32 2147483647, %v1101_v27 }
 0xb2d   :  { %v1119_v42 = vor.u32 1.1754944e-38, %v1118_v36  ;;  %vm1117_vm5 = vcmp.eq.f32.partialorder %v1116_v37, 8.507059e+37  ;;  %v1835_v37 = vld [vmem:[%s2404_s3 + $0x38] sm:$0xff] }
 0xb31   :  { %v1903_v26 = vpop.eup %1902 }
 0xb32   :  { %v1104_v5 = vpop.f32.mrf.mxu1  ;;  %v1108_v28 = vmul.f32 %v1903_v26, %v1101_v27  ;;  %vm1113_vm2 = vweird.f32 %v1903_v26 }
 0xb33   :  { %1904 = vrcp.f32 %v1104_v5  ;;  %vm1114_vm4 = vmor %vm1112_vm3, %vm1113_vm2  ;;  %v1133_v46 = vand.u32 2147483648, %v1104_v5  ;;  %vm1127_vm7 = vweird.f32 %v1104_v5  ;;  %v1131_v51 = vand.u32 2147483647, %v1104_v5 }
 0xb34   :  { %v1109_v8 = vsub.f32 1.0, %v1108_v28 }
 0xb35   :  { %v1134_v41 = vor.u32 1.1754944e-38, %v1133_v46  ;;  %vm1132_vm11 = vcmp.eq.f32.partialorder %v1131_v51, 8.507059e+37 }
 0xb36   :  { %v1110_v9 = vmul.f32 %v1903_v26, %v1109_v8 }
 0xb38   :  { %v1111_v34 = vadd.f32 %v1903_v26, %v1110_v9 }
 0xb39   :  { %v1905_v21 = vpop.eup %1904 }
 0xb3a   :  { %v1179_v6 = vpop.f32.mrf.mxu1  ;;  %v1123_v18 = vmul.f32 %v1905_v21, %v1104_v5  ;;  %v1115_v38 = vsel %vm1114_vm4, %v1903_v26, %v1111_v34  ;;  %vm1128_vm6 = vweird.f32 %v1905_v21  ;;  %v1864_v26 = vld [vmem:[#allocation5 + $0x10] ss:$0 sm:$0xff] }
 0xb3b   :  { %v1120_v44 = vsel %vm1117_vm5, %v1119_v42, %v1115_v38  ;;  %vm1129_vm10 = vmor %vm1127_vm7, %vm1128_vm6  ;;  %v1834_v38 = vld [vmem:[%s2404_s3 + $0x30] sm:$0xff]  ;;  %v1832_v42 = vld [vmem:[%s2404_s3 + $0x20] sm:$0xff] }
 0xb3c   :  { %v1124_v35 = vsub.f32 1.0, %v1123_v18  ;;  %v1121_v40 = vmul.f32 %v2323_v58, %v1120_v44  ;;  %v1866_v44 = vld [vmem:[#allocation5 + $0x12] ss:$0 sm:$0xff] }
 0xb3e   :  { %v1125_v39 = vmul.f32 %v1905_v21, %v1124_v35 }
 0xb40   :  { %v1126_v45 = vadd.f32 %v1905_v21, %v1125_v39  ;;  %v1833_v39 = vld [vmem:[%s2404_s3 + $0x28] sm:$0xff] }
 0xb42   :  { %v1181_v1 = vpop.f32.mrf.mxu1  ;;  %v1130_v50 = vsel %vm1129_vm10, %v1905_v21, %v1126_v45  ;;  %v1865_v21 = vld [vmem:[#allocation5 + $0x11] ss:$0 sm:$0xff] }
 0xb43   :  { %v1135_v52 = vsel %vm1132_vm11, %v1134_v41, %v1130_v50 }
 0xb44   :  { %v1136_v14 = vmul.f32 %v2327_v2, %v1135_v52 }
 0xb4a   :  { %v1184_v24 = vpop.f32.mrf.mxu1 }
 0xb52   :  { %v1186_v25 = vpop.f32.mrf.mxu1 }
 0xb5a   :  { %v1189_v7 = vpop.f32.mrf.mxu1 }
 0xb62   :  { %v1191_v23 = vpop.f32.mrf.mxu1 }
 0xb6a   :  { %v1194_v30 = vpop.f32.mrf.mxu1 }
 0xb72   :  { %v1196_v32 = vpop.f32.mrf.mxu1 }
 0xb73   :  { %1215 = vmatpush.msra.mxu2 %v1196_v32 }
 0xb75   :  { %1216 = vmatpush.msra.mxu2 %v1194_v30 }
 0xb77   :  { %1217 = vmatpush.msra.mxu2 %v1191_v23 }
 0xb79   :  { %1218 = vmatpush.msra.mxu2 %v1189_v7 }
 0xb7b   :  { %1219 = vmatpush.msra.mxu2 %v1186_v25 }
 0xb7d   :  { %1220 = vmatpush.msra.mxu2 %v1184_v24 }
 0xb7f   :  { %1221 = vmatpush.msra.mxu2 %v1181_v1 }
 0xb81   :  { %1222 = vmatpush.msra.mxu2 %v1179_v6 }
 0xb82   :  { %1749 = vmatmul.msk.f32.vlgmr.msra.gmra.mxu2 %vm429_vm9, %v1121_v40 }
 0xb8a   :  { %1750 = vmatmul.msk.f32.gmra.mxu2 %vm429_vm9, %v1136_v14 }
 0xc05   :  { %v1224_v47 = vpop.f32.mrf.mxu2 }
 0xc06   :  { %v1225_v56 = vadd.f32 %v1863_v55, %v1224_v47 }
 0xc08   :  { %v1230_v49 = vadd.f32 %v1225_v56, %v2260_v11 }
 0xc0a   :  { %v1234_v60 = vsel %vm89_vm0, %v1230_v49, 0.0 }
 0xc0b   :  { %1235 = vadd.xlane.f32.xlu1 %v1234_v60 }
 0xc0d   :  { %v1227_v43 = vpop.f32.mrf.mxu2 }
 0xc0e   :  { %v1228_v57 = vadd.f32 %v1863_v55, %v1227_v43 }
 0xc10   :  { %v1231_v61 = vadd.f32 %v1228_v57, %v2262_v59  ;;  %v1831_v59 = vld [vmem:[%s2403_s2 + $0x18] sm:$0xff] }
 0xc11   :  { %1313 = vmatpush.bf16.msrb.mxu2 %v1831_v59 }
 0xc12   :  { %v1237_v58 = vsel %vm89_vm0, %v1231_v61, 0.0 }
 0xc13   :  { %1238 = vadd.xlane.f32.xlu2 %v1237_v58 }
 0xc15   :  { %1314 = vmatpush.bf16.msrb.mxu2 %v1830_v20 }
 0xc19   :  { %1382 = vmatpush.bf16.msra.mxu2 %v1835_v37 }
 0xc1d   :  { %1383 = vmatpush.bf16.msra.mxu2 %v1834_v38 }
 0xc21   :  { %1384 = vmatpush.bf16.msra.mxu2 %v1833_v39 }
 0xc25   :  { %1385 = vmatpush.bf16.msra.mxu2 %v1832_v42  ;;  %v1868_v42 = vld [vmem:[#allocation5 + $0x14] ss:$0 sm:$0xff] }
 0xc7e   :  { %v1236_v63 = vpop.xlane.xlu1 %1235 }
 0xc7f   :  { %v1240_v48 = vmul.f32 %v1236_v63, %v2059_v10 }
 0xc81   :  { %v1242_v2 = vsub.f32 %v1230_v49, %v1240_v48 }
 0xc83   :  { %v1244_v0 = vmul.f32 %v1242_v2, %v1242_v2 }
 0xc85   :  { %v1246_v53 = vsel %vm89_vm0, %v1244_v0, 0.0 }
 0xc86   :  { %1247 = vadd.xlane.f32.xlu0 %v1246_v53  ;;  %v1239_v12 = vpop.xlane.xlu2 %1238 }
 0xc87   :  { %v1241_v11 = vmul.f32 %v1239_v12, %v2059_v10 }
 0xc89   :  { %v1243_v13 = vsub.f32 %v1231_v61, %v1241_v11  ;;  %v1867_v11 = vld [vmem:[#allocation5 + $0x13] ss:$0 sm:$0xff] }
 0xc8b   :  { %v1245_v15 = vmul.f32 %v1243_v13, %v1243_v13 }
 0xc8d   :  { %v1249_v54 = vsel %vm89_vm0, %v1245_v15, 0.0 }
 0xc8e   :  { %1250 = vadd.xlane.f32.xlu1 %v1249_v54 }
 0xcf9   :  { %v1248_v16 = vpop.xlane.xlu0 %1247 }
 0xcfa   :  { %v1252_v17 = vmul.f32 %v1248_v16, %v2059_v10 }
 0xcfc   :  { %v1254_v19 = vadd.f32 1e-12, %v1252_v17 }
 0xcfe   :  { %1906 = vrsqrt.f32 %v1254_v19  ;;  %vm1262_vm13 = vweird.f32 %v1254_v19 }
 0xd01   :  { %v1251_v22 = vpop.xlane.xlu1 %1250 }
 0xd02   :  { %v1253_v33 = vmul.f32 %v1251_v22, %v2059_v10 }
 0xd04   :  { %v1907_v62 = vpop.eup %1906  ;;  %v1255_v31 = vadd.f32 1e-12, %v1253_v33 }
 0xd05   :  { %v1257_v3 = vmul.f32 %v1907_v62, %v1254_v19  ;;  %vm1263_vm12 = vweird.f32 %v1907_v62 }
 0xd06   :  { %1908 = vrsqrt.f32 %v1255_v31  ;;  %vm1264_vm14 = vmor %vm1262_vm13, %vm1263_vm12  ;;  %vm1272_vm1 = vweird.f32 %v1255_v31 }
 0xd07   :  { %v1258_v4 = vmul.f32 %v1907_v62, %v1257_v3 }
 0xd09   :  { %v1259_v29 = vmul.f32 0.5, %v1258_v4 }
 0xd0b   :  { %v1260_v27 = vsub.f32 1.5, %v1259_v29 }
 0xd0c   :  { %v1909_v5 = vpop.eup %1908 }
 0xd0d   :  { %v1261_v6 = vmul.f32 %v1907_v62, %v1260_v27  ;;  %v1267_v1 = vmul.f32 %v1909_v5, %v1255_v31  ;;  %vm1273_vm15 = vweird.f32 %v1909_v5 }
 0xd0e   :  { %vm1274_vm2 = vmor %vm1272_vm1, %vm1273_vm15 }
 0xd0f   :  { %v1268_v24 = vmul.f32 %v1909_v5, %v1267_v1  ;;  %v1265_v25 = vsel %vm1264_vm14, %v1907_v62, %v1261_v6 }
 0xd10   :  { %v1276_v28 = vmul.f32 %v1265_v25, %v1242_v2 }
 0xd11   :  { %v1269_v7 = vmul.f32 0.5, %v1268_v24 }
 0xd12   :  { %v1279_v9 = vmul.f32 %v1864_v26, %v1276_v28 }
 0xd13   :  { %v1270_v23 = vsub.f32 1.5, %v1269_v7 }
 0xd14   :  { %v1282_v34 = vadd.f32 %v1865_v21, %v1279_v9 }
 0xd15   :  { %v1271_v30 = vmul.f32 %v1909_v5, %v1270_v23  ;;  %v1837_v23 = vld [vmem:[#allocation2 + $0x88] sm:$0xff] }
 0xd16   :  { %1498 = vmatpush.bf16.msra.mxu0 %v1837_v23 }
 0xd17   :  { %v1275_v8 = vsel %vm1274_vm2, %v1909_v5, %v1271_v30 }
 0xd18   :  { %v1277_v18 = vmul.f32 %v1275_v8, %v1243_v13 }
 0xd1a   :  { %v1280_v32 = vmul.f32 %v1864_v26, %v1277_v18 }
 0xd1c   :  { %v1283_v35 = vadd.f32 %v1865_v21, %v1280_v32 }
 0xd1e   :  { %v1284_v36 = vpack.c.bf16 %v1283_v35, %v1282_v34 }
 0xd20   :  { %1763 = vmatmul.msk.bf16.vlgmr.msrb.gmra.mxu2 %vm89_vm0, %v1284_v36 }
 0xda3   :  { %v1316_v45 = vpop.f32.mrf.mxu2 }
 0xda4   :  { %v1317_v46 = vadd.f32 %v1866_v44, %v1316_v45 }
 0xda6   :  { %v1323_v40 = vmul.f32 0.044715, %v1317_v46  ;;  %v1321_v63 = vmul.f32 0.5, %v1317_v46 }
 0xda8   :  { %v1325_v51 = vmul.f32 %v1323_v40, %v1317_v46 }
 0xdaa   :  { %v1327_v50 = vmul.f32 %v1325_v51, %v1317_v46  ;;  %v1869_v51 = vld [vmem:[#allocation5 + $0x15] ss:$0 sm:$0xff] }
 0xdab   :  { %v1318_v41 = vpop.f32.mrf.mxu2 }
 0xdac   :  { %v1329_v52 = vadd.f32 %v1327_v50, %v1317_v46  ;;  %v1319_v14 = vadd.f32 %v1866_v44, %v1318_v41 }
 0xdae   :  { %v1324_v55 = vmul.f32 0.044715, %v1319_v14  ;;  %v1331_v47 = vmul.f32 0.7978846, %v1329_v52  ;;  %v1322_v48 = vmul.f32 0.5, %v1319_v14 }
 0xdb0   :  { %v1326_v56 = vmul.f32 %v1324_v55, %v1319_v14  ;;  %1910 = vtanh.f32 %v1331_v47  ;;  %v1836_v55 = vld [vmem:[#allocation2 + $0x80] sm:$0xff] }
 0xdb1   :  { %1499 = vmatpush.bf16.msra.mxu0 %v1836_v55 }
 0xdb2   :  { %v1328_v49 = vmul.f32 %v1326_v56, %v1319_v14 }
 0xdb4   :  { %v1330_v60 = vadd.f32 %v1328_v49, %v1319_v14  ;;  %v83_v14 = vld [vmem:[#allocation5 + $0x20] sm:$0x3]  ;;  %v1839_v49 = vld [vmem:[%s2405_s4 + $0x8] sm:$0xff] }
 0xdb5   :  { %1534 = vmatpush.bf16.msrb.mxu2 %v1839_v49 }
 0xdb6   :  { %v1332_v43 = vmul.f32 0.7978846, %v1330_v60  ;;  %v1911_v57 = vpop.eup %1910  ;;  %v1838_v60 = vld [vmem:[%s2405_s4] sm:$0xff]  ;;  %s2009_s4 = smov [#allocation7]  }
 0xdb7   :  { %v1335_v61 = vadd.f32 1.0, %v1911_v57  ;;  %s1574_s12 = sshll.u32 %s2009_s4, 4  ;;  %s1575_s12 = int_to_ptr.vmem [resolvable:$true] %s1574_s12 }
 0xdb8   :  { %1912 = vtanh.f32 %v1332_v43  ;;  %v1870_v43 = vld [vmem:[#allocation5 + $0x16] ss:$0 sm:$0xff] }
 0xdb9   :  { %v1337_v0 = vmul.f32 %v1335_v61, %v1321_v63  ;;  %1535 = vmatpush.bf16.msrb.mxu2 %v1838_v60 }
 0xdbe   :  { %v1913_v58 = vpop.eup %1912 }
 0xdbf   :  { %v1336_v2 = vadd.f32 1.0, %v1913_v58 }
 0xdc1   :  { %v1338_v53 = vmul.f32 %v1336_v2, %v1322_v48  ;;  %v1871_v2 = vld [vmem:[#allocation5 + $0x17] ss:$0 sm:$0xff] }
 0xdc3   :  { %v1339_v12 = vpack.c.bf16 %v1338_v53, %v1337_v0  ;;  %v84_v53 = vld [vmem:[#allocation5 + $0x18] sm:$0x3] }
 0xdc5   :  { %1788 = vmatmul.msk.bf16.vlgmr.msra.gmra.mxu2 %vm429_vm9, %v1339_v12 }
 0xe48   :  { %v1387_v13 = vpop.f32.mrf.mxu2 }
 0xe49   :  { %v1388_v15 = vadd.f32 %v1867_v11, %v1387_v13 }
 0xe4b   :  { %v1392_v54 = vadd.f32 %v1388_v15, %v1282_v34 }
 0xe4d   :  { %v1396_v59 = vsel %vm89_vm0, %v1392_v54, 0.0 }
 0xe4e   :  { %1397 = vadd.xlane.f32.xlu0 %v1396_v59 }
 0xe50   :  { %v1389_v16 = vpop.f32.mrf.mxu2 }
 0xe51   :  { %v1390_v17 = vadd.f32 %v1867_v11, %v1389_v16 }
 0xe53   :  { %v1393_v19 = vadd.f32 %v1390_v17, %v1283_v35 }
 0xe55   :  { %v1399_v20 = vsel %vm89_vm0, %v1393_v19, 0.0 }
 0xe56   :  { %1400 = vadd.xlane.f32.xlu2 %v1399_v20 }
 0xec1   :  { %v1398_v22 = vpop.xlane.xlu0 %1397 }
 0xec2   :  { %v1402_v33 = vmul.f32 %v1398_v22, %v2059_v10 }
 0xec4   :  { %v1404_v62 = vsub.f32 %v1392_v54, %v1402_v33 }
 0xec6   :  { %v1406_v31 = vmul.f32 %v1404_v62, %v1404_v62 }
 0xec8   :  { %v1408_v3 = vsel %vm89_vm0, %v1406_v31, 0.0 }
 0xec9   :  { %v1401_v4 = vpop.xlane.xlu2 %1400  ;;  %1409 = vadd.xlane.f32.xlu2 %v1408_v3 }
 0xeca   :  { %v1403_v29 = vmul.f32 %v1401_v4, %v2059_v10 }
 0xecc   :  { %v1405_v27 = vsub.f32 %v1393_v19, %v1403_v29 }
 0xece   :  { %v1407_v5 = vmul.f32 %v1405_v27, %v1405_v27 }
 0xed0   :  { %v1411_v6 = vsel %vm89_vm0, %v1407_v5, 0.0 }
 0xed1   :  { %1412 = vadd.xlane.f32.xlu1 %v1411_v6 }
 0xf3c   :  { %v1410_v1 = vpop.xlane.xlu2 %1409 }
 0xf3d   :  { %v1414_v24 = vmul.f32 %v1410_v1, %v2059_v10 }
 0xf3f   :  { %v1416_v25 = vadd.f32 1e-12, %v1414_v24 }
 0xf41   :  { %1914 = vrsqrt.f32 %v1416_v25  ;;  %vm1424_vm3 = vweird.f32 %v1416_v25 }
 0xf44   :  { %v1413_v7 = vpop.xlane.xlu1 %1412 }
 0xf45   :  { %v1415_v26 = vmul.f32 %v1413_v7, %v2059_v10 }
 0xf47   :  { %v1915_v28 = vpop.eup %1914  ;;  %v1417_v30 = vadd.f32 1e-12, %v1415_v26 }
 0xf48   :  { %v1419_v8 = vmul.f32 %v1915_v28, %v1416_v25  ;;  %vm1425_vm9 = vweird.f32 %v1915_v28 }
 0xf49   :  { %1916 = vrsqrt.f32 %v1417_v30  ;;  %vm1426_vm4 = vmor %vm1424_vm3, %vm1425_vm9  ;;  %vm1434_vm6 = vweird.f32 %v1417_v30 }
 0xf4a   :  { %v1420_v21 = vmul.f32 %v1915_v28, %v1419_v8 }
 0xf4c   :  { %v1421_v9 = vmul.f32 0.5, %v1420_v21 }
 0xf4e   :  { %v1422_v18 = vsub.f32 1.5, %v1421_v9 }
 0xf4f   :  { %v1917_v32 = vpop.eup %1916 }
 0xf50   :  { %v1429_v34 = vmul.f32 %v1917_v32, %v1417_v30  ;;  %v1423_v35 = vmul.f32 %v1915_v28, %v1422_v18  ;;  %vm1435_vm5 = vweird.f32 %v1917_v32 }
 0xf51   :  { %vm1436_vm7 = vmor %vm1434_vm6, %vm1435_vm5 }
 0xf52   :  { %v1430_v36 = vmul.f32 %v1917_v32, %v1429_v34  ;;  %v1427_v38 = vsel %vm1426_vm4, %v1915_v28, %v1423_v35 }
 0xf53   :  { %v1438_v44 = vmul.f32 %v1427_v38, %v1404_v62 }
 0xf54   :  { %v1431_v37 = vmul.f32 0.5, %v1430_v36 }
 0xf55   :  { %v1441_v50 = vmul.f32 %v1868_v42, %v1438_v44 }
 0xf56   :  { %v1432_v39 = vsub.f32 1.5, %v1431_v37 }
 0xf57   :  { %v1444_v52 = vadd.f32 %v1869_v51, %v1441_v50 }
 0xf58   :  { %v1433_v10 = vmul.f32 %v1917_v32, %v1432_v39 }
 0xf5a   :  { %v1437_v45 = vsel %vm1436_vm7, %v1917_v32, %v1433_v10 }
 0xf5b   :  { %v1439_v46 = vmul.f32 %v1437_v45, %v1405_v27 }
 0xf5d   :  { %v1442_v40 = vmul.f32 %v1868_v42, %v1439_v46 }
 0xf5f   :  { %v1445_v41 = vadd.f32 %v1869_v51, %v1442_v40 }
 0xf61   :  { %1463 = vmatpush.msra.mxu3 %v1445_v41 }
 0xf63   :  { %1464 = vmatpush.msra.mxu3 %v1444_v52 }
 0xf64   :  { %1789 = vmatmul.msk.f32.vlgmr.msra.gmra.mxu3 %vm249_vm8, %v83_v14  ;;  %vm1542_vm8 = vcmask 1041408  }
 0xfe7   :  { %v1466_v47 = vpop.f32.mrf.mxu3 }
 0xfe8   :  { %v1469_v56 = vpack.c.bf16 %v1466_v47, %v1466_v47 }
 0xfea   :  { %1798 = vmatmul.msk.bf16.vlgmr.msra.gmra.mxu0 %vm89_vm0, %v1469_v56 }
0x1067   :  { %v1501_v57 = vpop.f32.mrf.mxu0 }
0x1068   :  { %v1502_v61 = vadd.f32 %v1870_v43, %v1501_v57 }
0x106a   :  { %1918 = vtanh.f32 %v1502_v61 }
0x106f   :  { %v1503_v58 = vpop.f32.mrf.mxu0 }
0x1070   :  { %v1919_v63 = vpop.eup %1918 }
0x1071   :  { %v1506_v48 = vpack.c.bf16 %v1919_v63, %v1919_v63 }
0x1073   :  { %1807 = vmatmul.msk.bf16.vlgmr.msrb.gmra.mxu2 %vm89_vm0, %v1506_v48 }
0x10f6   :  { %v1537_v0 = vpop.f32.mrf.mxu2 }
0x10f7   :  { %v1538_v12 = vadd.f32 %v1871_v2, %v1537_v0 }
0x10f9   :  { %1541 = vst [vmem:[#allocation7] sm:$0x3] %v1538_v12  ;;  %v1543_v11 = vsel %vm1542_vm8, %v1538_v12, -inf  ;;  %v1555_v13 = vmul.f32 %v1538_v12, %v84_v53 }
0x10fa   :  { %1544 = vmax.xlane.f32.xlu0 %v1543_v11 }
0x10fb   :  { %v1556_v15 = vsel %vm1542_vm8, %v1555_v13, 0.0 }
0x10fc   :  { %1557 = vadd.xlane.f32.xlu2 %v1556_v15 }
0x10fe   :  { %v1539_v54 = vpop.f32.mrf.mxu2 }
0x116d   :  { %v1545_v59 = vpop.xlane.xlu0 %1544 }
0x116e   :  { %v1546_v16 = vsub.f32 %v1538_v12, %v1545_v59 }
0x116f   :  { %v1558_v3 = vpop.xlane.xlu2 %1557 }
0x1170   :  { %v1547_v17 = vmul.f32 1.442695, %v1546_v16 }
0x1172   :  { %1920 = vpow2.f32 %v1547_v17 }
0x1178   :  { %v1921_v19 = vpop.eup %1920 }
0x1179   :  { %v1549_v20 = vsel %vm1542_vm8, %v1921_v19, 0.0 }
0x117a   :  { %1550 = vadd.xlane.f32.xlu1 %v1549_v20 }
0x11ed   :  { %v1551_v22 = vpop.xlane.xlu1 %1550 }
0x11ee   :  { %1922 = vlog2.f32 %v1551_v22 }
0x11f4   :  { %v1923_v33 = vpop.eup %1922 }
0x11f5   :  { %v1553_v62 = vmul.f32 0.6931472, %v1923_v33 }
0x11f7   :  { %v1554_v31 = vadd.f32 %v1553_v62, %v1545_v59 }
0x11f9   :  { %v1559_v4 = vsub.f32 %v1554_v31, %v1558_v3 }
0x11fb   :  { %v1560_v29 = vsel %vm1542_vm8, %v1559_v4, 0.0 }
0x11fc   :  { %v1561_v27 = vrot.slane %v1560_v29, 4 }
0x11fe   :  { %v1562_v5 = vadd.f32 %v1561_v27, %v1560_v29 }
0x1200   :  { %v1563_v6 = vrot.slane %v1562_v5, 2 }
0x1202   :  { %v1564_v1 = vadd.f32 %v1563_v6, %v1562_v5 }
0x1204   :  { %v1565_v24 = vrot.slane %v1564_v1, 1 }
0x1206   :  { %v1566_v25 = vadd.f32 %v1565_v24, %v1564_v1 }
0x1208   :  { %v1567_v7 = vmul.f32 0.5, %v1566_v25 }
0x120a   :  { %1568 = vst [vmem:[#allocation7 + $0x2] sm:$0x3f] %v1567_v7 }
0x120b   :  { %1579 = dma.vmem_to_hbm [thread:$0]  %s1575_s12, 128, %s1577_s14, [#allocation4]  }
0x120c   :  { %2000 = dma.done.wait [#allocation4], 128  }
0x120d   :  { %2001 = vsyncadd [#allocation4], 4294967168 }
0x120e   :  { %1584 = vsyncpa [#allocation3], 1 }
0x120f   :  { %1585 = vsyncpa [#allocation6], 1 }
0x1210   :  { %1586 = vsyncpa [#allocation4], 1 }

</bundles_post_ra>
